<compile_context>
chip_gen: v7x
topology: tpu7x:2x2x1
jax: 0.10.0
libtpu: 0.0.40
codegen_flags: <defaults>
</compile_context>

<pallas_src>
import functools

import jax
import jax.numpy as jnp
from jax import lax
from jax.experimental import pallas as pl
from jax.experimental.pallas import tpu as pltpu

# ---- hyper-params fixed by VNN_F.__init__ -----------------------------------
Q0, Q1 = 2, 2
C0 = 96            # nch_out0 (true channel count)
CP = 128           # nch_out0 padded to a full lane width for TPU
C1 = 256           # nch_out1
N1 = C1 + 2 * Q1 * C1     # 1280 fused stage-2 output columns (conv11 | conv21)
K3 = 27 * CP              # 3456 im2col contraction depth
EPS = 1e-5
NUM_CH = 3
NUM_CLASSES = 10


# ------------------------------------------------------------------------------
# VMEM budgeting (generation-aware: v7x has 64 MiB/TC, v5e/v6e have 128 MiB).
# ------------------------------------------------------------------------------
def _usable_vmem_bytes():
    cap = 64 * 1024 * 1024                      # conservative default (v7x)
    try:
        cap = int(getattr(pltpu.get_tpu_info(), "vmem_capacity_bytes", cap))
    except Exception:
        pass
    return max(32 * 1024 * 1024, min(int(cap * 0.8), cap - (8 << 20)))


def _pick_dd(D, H, W, budget_bytes):
    """Largest depth block whose stage-2 working set fits the VMEM budget."""
    def est(dd):
        m = dd * H * W
        slab = m * 27 * CP * 2                           # bf16 im2col slab
        win = (dd + 2) * (H + 2) * (W + 2) * CP * 2      # bf16 depth window
        wts = 2 * K3 * N1 * 2                            # bf16 fused weight (x2 bufs)
        outb = 2 * dd * (H // 2) * (W // 2) * C1 * 4     # f32 out block (x2 bufs)
        acc = 2 * m * N1 * 4                             # f32 matmul accumulator temps
        tmp = m * 2 * Q1 * C1 * 4 + (4 << 20)            # epilogue temps + slack
        return slab + win + wts + outb + acc + tmp
    for dd in sorted((d for d in range(1, D + 1) if D % d == 0), reverse=True):
        if est(dd) <= budget_bytes:
            return dd
    return 1


# ==============================================================================
# Stage 1: conv10 (1x1x1) + bn10, conv20 (1x1x1) + volterra(Q0) + bn20, add.
#   A 1x1x1 Conv3d is a per-voxel matmul over channels.  The fused (cin, 640)
#   weight gives one dot; the W/H halo is built in-register so the haloed bf16
#   output buffer is written exactly once with full-width aligned stores.
# ==============================================================================
def stage1_kernel(D, H, W, x_ref, w_ref, b_ref, s10_ref, t10_ref,
                  s20_ref, t20_ref, o_ref):
    x = x_ref[0]                                               # (D*H*W, Cin)
    y = jnp.dot(x, w_ref[...], preferred_element_type=jnp.float32) + b_ref[...]
    x10 = y[:, :CP] * s10_ref[...] + t10_ref[...]              # conv10 + bn10 (folded)
    x20 = y[:, CP:]                                            # conv20: [Aq0|Aq1|Bq0|Bq1]
    g = Q0 * CP
    mul = x20[:, :g] * x20[:, g:2 * g]                         # volterra pairwise mul
    vol = mul[:, :CP] + mul[:, CP:2 * CP]                      # sum over Q0 terms
    vol = vol * s20_ref[...] + t20_ref[...]                    # bn20 (folded)
    out = (x10 + vol).reshape(D, H, W, CP)
    # Build the halo in-register (full-width aligned stores; no masked vst,
    # no double store of the whole buffer).
    zw = jnp.zeros((D, H, 1, CP), jnp.float32)
    out = jnp.concatenate([zw, out, zw], axis=2)               # (D, H, W+2, CP)
    zh = jnp.zeros((D, 1, W + 2, CP), jnp.float32)
    out = jnp.concatenate([zh, out, zh], axis=1)               # (D, H+2, W+2, CP)
    out = out.astype(o_ref.dtype)                              # bf16 inter-stage buffer
    zd = jnp.zeros((1, H + 2, W + 2, CP), o_ref.dtype)
    out = jnp.concatenate([zd, out, zd], axis=0)               # (D+2, H+2, W+2, CP)
    o_ref[0] = out


def stage1(x_flat, w01, b01, s10, t10, s20, t20, *, B, D, H, W, vmem_limit):
    cin = x_flat.shape[-1]
    kern = functools.partial(stage1_kernel, D, H, W)
    full = lambda a: pl.BlockSpec(a.shape, lambda b: (0, 0))
    return pl.pallas_call(
        kern,
        out_shape=jax.ShapeDtypeStruct((B, D + 2, H + 2, W + 2, CP), jnp.bfloat16),
        grid=(B,),
        in_specs=[pl.BlockSpec((1, D * H * W, cin), lambda b: (b, 0, 0)),
                  full(w01), full(b01), full(s10), full(t10), full(s20), full(t20)],
        out_specs=pl.BlockSpec((1, D + 2, H + 2, W + 2, CP),
                               lambda b: (b, 0, 0, 0, 0)),
        compiler_params=pltpu.CompilerParams(
            dimension_semantics=("parallel",),
            vmem_limit_bytes=vmem_limit),
    )(x_flat, w01, b01, s10, t10, s20, t20)


# ==============================================================================
# Stage 2: conv11 (3x3x3,pad1) + bn11, conv21 (3x3x3,pad1) + volterra(Q1) + bn21,
#          add, maxpool (1,2,2).  One grid point per (batch, Dd-depth block).
#   The haloed bf16 volume stays in HBM; only a (Dd+2) depth window is DMA'ed
#   into VMEM.  The 27 taps are im2col'ed into a lane-dense bf16 slab; the fused
#   (3456, 1280) bf16 weight is consumed in 3 kd-groups of K=1152 so the partial
#   dots overlap the next group's gather.
# ==============================================================================
def stage2_kernel(H, W, Dd, xp_hbm, w_ref, b_ref, s11_ref, t11_ref,
                  s21_ref, t21_ref, o_ref, win_ref, slab_ref, dma_sem):
    b = pl.program_id(0)
    d0 = pl.program_id(1) * Dd
    # Depth-window DMA: only (Dd+2) padded depth slices are resident in VMEM.
    cp = pltpu.make_async_copy(xp_hbm.at[b, pl.ds(d0, Dd + 2)], win_ref, dma_sem)
    cp.start()
    cp.wait()

    m = Dd * H * W
    kg = 9 * CP
    acc = None
    for kd in range(3):
        # im2col for this kd-group: load each (kd, kh) row once, derive the three
        # kw shifts by in-register slicing (cross-lane work hides under the MXU).
        for kh in range(3):
            row = win_ref[kd:kd + Dd, kh:kh + H, :, :]         # (Dd, H, W+2, CP) bf16
            for kw in range(3):
                t = kd * 9 + kh * 3 + kw
                slab_ref[:, t * CP:(t + 1) * CP] = (
                    row[:, :, kw:kw + W, :].reshape(m, CP))
        # Partial deep-K matmul for this group (conv11 | conv21 fused in one weight);
        # no WAR hazard on the full slab, so the next group's fill can overlap.
        part = jnp.dot(slab_ref[:, kd * kg:(kd + 1) * kg],
                       w_ref[kd * kg:(kd + 1) * kg, :],
                       preferred_element_type=jnp.float32)
        acc = part if acc is None else acc + part

    y = acc + b_ref[...]                                       # f32 epilogue
    y11 = y[:, :C1] * s11_ref[...] + t11_ref[...]              # conv11 + bn11 (folded)
    y21 = y[:, C1:]
    mul = y21[:, :Q1 * C1] * y21[:, Q1 * C1:2 * Q1 * C1]       # volterra pairwise mul
    vol = mul[:, :C1] + mul[:, C1:2 * C1]                      # sum over Q1 terms
    vol = vol * s21_ref[...] + t21_ref[...]                    # bn21 (folded)
    z = (y11 + vol).reshape(Dd * (H // 2), 2, W // 2, 2, C1)
    p = jnp.maximum(jnp.maximum(z[:, 0, :, 0, :], z[:, 0, :, 1, :]),
                    jnp.maximum(z[:, 1, :, 0, :], z[:, 1, :, 1, :]))   # maxpool (1,2,2)
    o_ref[0] = p.reshape(Dd, H // 2, W // 2, C1)


def stage2(xp, w1, b1, s11, t11, s21, t21, *, B, D, H, W, Dd, vmem_limit):
    assert D % Dd == 0 and H % 2 == 0 and W % 2 == 0
    kern = functools.partial(stage2_kernel, H, W, Dd)
    full = lambda a: pl.BlockSpec(a.shape, lambda b, d: (0, 0))
    return pl.pallas_call(
        kern,
        out_shape=jax.ShapeDtypeStruct((B, D, H // 2, W // 2, C1), jnp.float32),
        grid=(B, D // Dd),
        in_specs=[pl.BlockSpec(memory_space=pl.ANY),   # haloed bf16 volume stays in HBM
                  full(w1), full(b1), full(s11), full(t11), full(s21), full(t21)],
        out_specs=pl.BlockSpec((1, Dd, H // 2, W // 2, C1),
                               lambda b, d: (b, d, 0, 0, 0)),
        scratch_shapes=[pltpu.VMEM((Dd + 2, H + 2, W + 2, CP), jnp.bfloat16),
                        pltpu.VMEM((Dd * H * W, 27 * CP), jnp.bfloat16),
                        pltpu.SemaphoreType.DMA],
        compiler_params=pltpu.CompilerParams(
            dimension_semantics=("parallel", "parallel"),
            vmem_limit_bytes=vmem_limit),
    )(xp, w1, b1, s11, t11, s21, t21)


# ==============================================================================
# fc8 (Linear): K-tiled matmul with a VMEM accumulator.  The weight is kept
# unpadded (F, num_classes) so no extra HBM bytes are read for pad lanes.
# ==============================================================================
def fc_kernel(x_ref, w_ref, b_ref, o_ref, acc_ref):
    k = pl.program_id(0)

    @pl.when(k == 0)
    def _():
        acc_ref[...] = jnp.zeros_like(acc_ref)

    acc_ref[...] += jnp.dot(x_ref[...], w_ref[...],
                            preferred_element_type=jnp.float32)

    @pl.when(k == pl.num_programs(0) - 1)
    def _():
        o_ref[...] = acc_ref[...] + b_ref[...]


def fc(x_flat, w_t, b):
    Bn, F = x_flat.shape
    ncols = w_t.shape[1]
    tk = next((t for t in (8192, 4096, 2048, 1024, 512, 256, 128) if F % t == 0), F)
    return pl.pallas_call(
        fc_kernel,
        out_shape=jax.ShapeDtypeStruct((Bn, ncols), jnp.float32),
        grid=(F // tk,),
        in_specs=[pl.BlockSpec((Bn, tk), lambda k: (0, k)),
                  pl.BlockSpec((tk, ncols), lambda k: (k, 0)),
                  pl.BlockSpec((1, ncols), lambda k: (0, 0))],
        out_specs=pl.BlockSpec((Bn, ncols), lambda k: (0, 0)),
        scratch_shapes=[pltpu.VMEM((Bn, ncols), jnp.float32)],
        compiler_params=pltpu.CompilerParams(dimension_semantics=("arbitrary",)),
    )(x_flat, w_t, b)


# ==============================================================================
# Full forward (Pallas path)
# ==============================================================================
def vnn_f_forward(x_ncdhw, p):
    B, cin, D, H, W = x_ncdhw.shape
    vmem_budget = _usable_vmem_bytes()
    # NCDHW -> channels-last, voxels flattened for the pointwise stage
    x_flat = jnp.transpose(x_ncdhw, (0, 2, 3, 4, 1)).reshape(B, D * H * W, cin)
    # stage1 emits a zero-haloed, channel-padded, bf16 volume (no jnp.pad round trip).
    y0p = stage1(x_flat, p['w01'], p['b01'], p['s10'], p['t10'], p['s20'], p['t20'],
                 B=B, D=D, H=H, W=W, vmem_limit=vmem_budget)
    Dd = _pick_dd(D, H, W, vmem_budget)
    y1 = stage2(y0p, p['w1'], p['b1'], p['s11'], p['t11'], p['s21'], p['t21'],
                B=B, D=D, H=H, W=W, Dd=Dd, vmem_limit=vmem_budget)
    # torch flattens a (B, C, D, H/2, W/2) tensor -> match that ordering
    flat = jnp.transpose(y1, (0, 4, 1, 2, 3)).reshape(B, -1)
    # TODO(synk): dropout(p=0.5) implemented as eval-mode identity (no RNG mask)
    return fc(flat, p['wfc_t'], p['bfc'])


# ==============================================================================
# Parameter construction (deterministic, torch-layout) + pure-JAX reference
# ==============================================================================
def make_params(key, cin, num_classes, flat_features):
    keys = iter(jax.random.split(key, 32))

    def conv_w(o, i, k):  # kaiming fan_out, OIDHW layout
        fan_out = o * k ** 3
        return jax.random.normal(next(keys), (o, i, k, k, k),
                                 jnp.float32) * (2.0 / fan_out) ** 0.5

    def conv_b(o, i, k):
        bound = 1.0 / (i * k ** 3) ** 0.5
        return jax.random.uniform(next(keys), (o,), jnp.float32, -bound, bound)

    def bn(c):
        gamma = 1.0 + 0.1 * jax.random.normal(next(keys), (c,), jnp.float32)
        beta = 0.1 * jax.random.normal(next(keys), (c,), jnp.float32)
        mean = 0.1 * jax.random.normal(next(keys), (c,), jnp.float32)
        var = 1.0 + 0.1 * jnp.abs(jax.random.normal(next(keys), (c,), jnp.float32))
        return gamma, beta, mean, var

    raw = {}
    raw['W10'], raw['bc10'] = conv_w(C0, cin, 1), conv_b(C0, cin, 1)
    raw['W20'], raw['bc20'] = conv_w(2 * Q0 * C0, cin, 1), conv_b(2 * Q0 * C0, cin, 1)
    raw['W11'], raw['bc11'] = conv_w(C1, C0, 3), conv_b(C1, C0, 3)
    raw['W21'], raw['bc21'] = conv_w(2 * Q1 * C1, C0, 3), conv_b(2 * Q1 * C1, C0, 3)
    raw['bn10'], raw['bn20'] = bn(C0), bn(C0)
    raw['bn11'], raw['bn21'] = bn(C1), bn(C1)
    # fc8 (the torch module hard-codes 200704 input features; sized for our shape)
    raw['Wfc'] = jax.random.normal(next(keys), (num_classes, flat_features),
                                   jnp.float32) / flat_features ** 0.5
    raw['bfc'] = 0.01 * jax.random.normal(next(keys), (num_classes,), jnp.float32)

    def fold_bn(g, b, m, v):
        scale = g / jnp.sqrt(v + EPS)
        shift = b - m * scale
        return scale.reshape(1, -1), shift.reshape(1, -1)

    pad_cols = lambda a, n: jnp.pad(a, ((0, 0), (0, n - a.shape[1])))

    ker = {}
    # --- stage1: fused 1x1x1 weights, each 96-wide group zero-padded to 128 ----
    w10p = pad_cols(raw['W10'].reshape(C0, cin).T, CP)                  # (cin, 128)
    b10p = pad_cols(raw['bc10'].reshape(1, -1), CP)
    w20m = raw['W20'].reshape(2 * Q0 * C0, cin)
    b20m = raw['bc20'].reshape(2 * Q0, C0)
    w20p = jnp.concatenate(
        [pad_cols(w20m[g * C0:(g + 1) * C0].T, CP) for g in range(2 * Q0)], axis=1)
    b20p = jnp.concatenate(
        [pad_cols(b20m[g].reshape(1, -1), CP) for g in range(2 * Q0)], axis=1)
    ker['w01'] = jnp.concatenate([w10p, w20p], axis=1)                  # (cin, 640)
    ker['b01'] = jnp.concatenate([b10p, b20p], axis=1)                  # (1, 640)
    s10, t10 = fold_bn(*raw['bn10'])
    ker['s10'], ker['t10'] = pad_cols(s10, CP), pad_cols(t10, CP)
    s20, t20 = fold_bn(*raw['bn20'])
    ker['s20'], ker['t20'] = pad_cols(s20, CP), pad_cols(t20, CP)

    # --- stage2: fused 3x3x3 weights as one bf16 im2col matmul weight ----------
    def conv3_w(w_oidhw, cout):
        wt = jnp.transpose(w_oidhw, (2, 3, 4, 1, 0))        # (kd, kh, kw, I, O)
        wt = jnp.pad(wt, ((0, 0), (0, 0), (0, 0), (0, CP - C0), (0, 0)))
        return wt.reshape(27 * CP, cout)

    ker['w1'] = jnp.concatenate(
        [conv3_w(raw['W11'], C1), conv3_w(raw['W21'], 2 * Q1 * C1)],
        axis=1).astype(jnp.bfloat16)                                    # (3456, 1280)
    ker['b1'] = jnp.concatenate([raw['bc11'], raw['bc21']]).reshape(1, -1)  # (1, 1280)
    ker['s11'], ker['t11'] = fold_bn(*raw['bn11'])
    ker['s21'], ker['t21'] = fold_bn(*raw['bn21'])

    # --- fc8: unpadded weight (F, num_classes) ----------------------------------
    ker['wfc_t'] = raw['Wfc'].T
    ker['bfc'] = raw['bfc'].reshape(1, -1)
    return raw, ker


def reference(x, r):
    """Pure-JAX (XLA) f32 reference with torch NCDHW semantics."""
    def conv(inp, w, b, pad):
        out = lax.conv_general_dilated(
            inp, w, (1, 1, 1), [(pad, pad)] * 3,
            dimension_numbers=('NCDHW', 'OIDHW', 'NCDHW'),
            precision=lax.Precision.HIGHEST)
        return out + b.reshape(1, -1, 1, 1, 1)

    def bn(inp, params):
        g, b, m, v = params
        r5 = lambda a: a.reshape(1, -1, 1, 1, 1)
        return (inp - r5(m)) / jnp.sqrt(r5(v) + EPS) * r5(g) + r5(b)

    x10 = bn(conv(x, r['W10'], r['bc10'], 0), r['bn10'])
    x20 = conv(x, r['W20'], r['bc20'], 0)
    mul = x20[:, :Q0 * C0] * x20[:, Q0 * C0:]
    vol = mul[:, :C0] + mul[:, C0:2 * C0]
    h = x10 + bn(vol, r['bn20'])
    x11 = bn(conv(h, r['W11'], r['bc11'], 1), r['bn11'])
    x21 = conv(h, r['W21'], r['bc21'], 1)
    mul = x21[:, :Q1 * C1] * x21[:, Q1 * C1:]
    vol = mul[:, :C1] + mul[:, C1:2 * C1]
    y = x11 + bn(vol, r['bn21'])
    y = lax.reduce_window(y, -jnp.inf, lax.max,
                          (1, 1, 1, 2, 2), (1, 1, 1, 2, 2), 'VALID')
    flat = y.reshape(y.shape[0], -1)
    return jnp.dot(flat, r['Wfc'].T, precision=lax.Precision.HIGHEST) + r['bfc']


# ==============================================================================
if __name__ == "__main__":
    B, D, H, W = 2, 4, 8, 8
    flat_features = C1 * D * (H // 2) * (W // 2)

    key = jax.random.PRNGKey(0)
    kx, kp = jax.random.split(key)
    x = jax.random.normal(kx, (B, NUM_CH, D, H, W), jnp.float32)

    raw_params, ker_params = make_params(kp, NUM_CH, NUM_CLASSES, flat_features)

    out = jax.block_until_ready(vnn_f_forward(x, ker_params))

    ref = jax.block_until_ready(reference(x, raw_params))
    rel_err = float(jnp.max(jnp.abs(out - ref)) / (jnp.max(jnp.abs(ref)) + 1e-6))
    assert out.shape == (B, NUM_CLASSES), out.shape
    assert rel_err < 2e-2, f"mismatch vs reference: rel_err={rel_err}"

    print("KERNEL_OK")
</pallas_src>

<mosaic_0001>
module attributes {stable_mosaic.version = 11 : i64} {
  func.func @stage1_kernel(%arg0: i32, %arg1: memref<1x256x3xf32, #tpu.memory_space<vmem>>, %arg2: memref<3x640xf32, #tpu.memory_space<vmem>>, %arg3: memref<1x640xf32, #tpu.memory_space<vmem>>, %arg4: memref<1x128xf32, #tpu.memory_space<vmem>>, %arg5: memref<1x128xf32, #tpu.memory_space<vmem>>, %arg6: memref<1x128xf32, #tpu.memory_space<vmem>>, %arg7: memref<1x128xf32, #tpu.memory_space<vmem>>, %arg8: memref<1x6x10x10x128xbf16, #tpu.memory_space<vmem>>) attributes {dimension_semantics = [#tpu.dimension_semantics<parallel>], iteration_bounds = array<i64: 2>, scalar_prefetch = 0 : i64, scratch_operands = 0 : i64, tpu.core_type = #tpu.core_type<tc>, window_params = [{transform_indices = @transform_0, window_bounds = array<i64: 1, 256, 3>}, {pipeline_mode = #tpu.pipeline_mode<synchronous>, transform_indices = @transform_1, window_bounds = array<i64: 3, 640>}, {pipeline_mode = #tpu.pipeline_mode<synchronous>, transform_indices = @transform_2, window_bounds = array<i64: 1, 640>}, {pipeline_mode = #tpu.pipeline_mode<synchronous>, transform_indices = @transform_3, window_bounds = array<i64: 1, 128>}, {pipeline_mode = #tpu.pipeline_mode<synchronous>, transform_indices = @transform_4, window_bounds = array<i64: 1, 128>}, {pipeline_mode = #tpu.pipeline_mode<synchronous>, transform_indices = @transform_5, window_bounds = array<i64: 1, 128>}, {pipeline_mode = #tpu.pipeline_mode<synchronous>, transform_indices = @transform_6, window_bounds = array<i64: 1, 128>}, {transform_indices = @transform_7, window_bounds = array<i64: 1, 6, 10, 10, 128>}]} {
    %c0 = arith.constant 0 : index
    %c0_0 = arith.constant 0 : index
    %c0_1 = arith.constant 0 : index
    %0 = vector.load %arg1[%c0, %c0_0, %c0_1] : memref<1x256x3xf32, #tpu.memory_space<vmem>>, vector<1x256x3xf32>
    %1 = vector.shape_cast %0 : vector<1x256x3xf32> to vector<256x3xf32>
    %c0_2 = arith.constant 0 : index
    %c0_3 = arith.constant 0 : index
    %2 = vector.load %arg2[%c0_2, %c0_3] : memref<3x640xf32, #tpu.memory_space<vmem>>, vector<3x640xf32>
    %cst = arith.constant dense<0.000000e+00> : vector<256x640xf32>
    %3 = tpu.matmul %1, %2, %cst {dimension_numbers = #tpu.dot_dimension_numbers<[1], [0], [0], [1], [0, 0, 1, 1], [], []>} : vector<256x3xf32>, vector<3x640xf32>, vector<256x640xf32> -> vector<256x640xf32>
    %c0_4 = arith.constant 0 : index
    %c0_5 = arith.constant 0 : index
    %4 = vector.load %arg3[%c0_4, %c0_5] : memref<1x640xf32, #tpu.memory_space<vmem>>, vector<1x640xf32>
    %5 = vector.broadcast %4 : vector<1x640xf32> to vector<256x640xf32>
    %6 = arith.addf %3, %5 : vector<256x640xf32>
    %7 = vector.extract_strided_slice %6 {offsets = [0, 0], sizes = [256, 128], strides = [1, 1]} : vector<256x640xf32> to vector<256x128xf32>
    %c0_6 = arith.constant 0 : index
    %c0_7 = arith.constant 0 : index
    %8 = vector.load %arg4[%c0_6, %c0_7] : memref<1x128xf32, #tpu.memory_space<vmem>>, vector<1x128xf32>
    %9 = vector.broadcast %8 : vector<1x128xf32> to vector<256x128xf32>
    %10 = arith.mulf %7, %9 : vector<256x128xf32>
    %c0_8 = arith.constant 0 : index
    %c0_9 = arith.constant 0 : index
    %11 = vector.load %arg5[%c0_8, %c0_9] : memref<1x128xf32, #tpu.memory_space<vmem>>, vector<1x128xf32>
    %12 = vector.broadcast %11 : vector<1x128xf32> to vector<256x128xf32>
    %13 = arith.addf %10, %12 : vector<256x128xf32>
    %14 = vector.extract_strided_slice %6 {offsets = [0, 128], sizes = [256, 512], strides = [1, 1]} : vector<256x640xf32> to vector<256x512xf32>
    %15 = vector.extract_strided_slice %14 {offsets = [0, 0], sizes = [256, 256], strides = [1, 1]} : vector<256x512xf32> to vector<256x256xf32>
    %16 = vector.extract_strided_slice %14 {offsets = [0, 256], sizes = [256, 256], strides = [1, 1]} : vector<256x512xf32> to vector<256x256xf32>
    %17 = arith.mulf %15, %16 : vector<256x256xf32>
    %18 = vector.extract_strided_slice %17 {offsets = [0, 0], sizes = [256, 128], strides = [1, 1]} : vector<256x256xf32> to vector<256x128xf32>
    %19 = vector.extract_strided_slice %17 {offsets = [0, 128], sizes = [256, 128], strides = [1, 1]} : vector<256x256xf32> to vector<256x128xf32>
    %20 = arith.addf %18, %19 : vector<256x128xf32>
    %c0_10 = arith.constant 0 : index
    %c0_11 = arith.constant 0 : index
    %21 = vector.load %arg6[%c0_10, %c0_11] : memref<1x128xf32, #tpu.memory_space<vmem>>, vector<1x128xf32>
    %22 = vector.broadcast %21 : vector<1x128xf32> to vector<256x128xf32>
    %23 = arith.mulf %20, %22 : vector<256x128xf32>
    %c0_12 = arith.constant 0 : index
    %c0_13 = arith.constant 0 : index
    %24 = vector.load %arg7[%c0_12, %c0_13] : memref<1x128xf32, #tpu.memory_space<vmem>>, vector<1x128xf32>
    %25 = vector.broadcast %24 : vector<1x128xf32> to vector<256x128xf32>
    %26 = arith.addf %23, %25 : vector<256x128xf32>
    %27 = arith.addf %13, %26 : vector<256x128xf32>
    %28 = vector.shape_cast %27 : vector<256x128xf32> to vector<4x8x8x128xf32>
    %cst_14 = arith.constant 0.000000e+00 : f32
    %29 = vector.broadcast %cst_14 : f32 to vector<4x8x1x128xf32>
    %30 = tpu.concatenate %29, %28, %29 in 2 : vector<4x8x1x128xf32>, vector<4x8x8x128xf32>, vector<4x8x1x128xf32> -> vector<4x8x10x128xf32>
    %cst_15 = arith.constant 0.000000e+00 : f32
    %31 = vector.broadcast %cst_15 : f32 to vector<4x1x10x128xf32>
    %32 = tpu.concatenate %31, %30, %31 in 1 : vector<4x1x10x128xf32>, vector<4x8x10x128xf32>, vector<4x1x10x128xf32> -> vector<4x10x10x128xf32>
    %33 = arith.truncf %32 : vector<4x10x10x128xf32> to vector<4x10x10x128xbf16>
    %cst_16 = arith.constant 0.000000e+00 : bf16
    %34 = vector.broadcast %cst_16 : bf16 to vector<1x10x10x128xbf16>
    %35 = tpu.concatenate %34, %33, %34 in 0 : vector<1x10x10x128xbf16>, vector<4x10x10x128xbf16>, vector<1x10x10x128xbf16> -> vector<6x10x10x128xbf16>
    %c0_17 = arith.constant 0 : index
    %c0_18 = arith.constant 0 : index
    %c0_19 = arith.constant 0 : index
    %c0_20 = arith.constant 0 : index
    %c0_21 = arith.constant 0 : index
    %36 = vector.load %arg8[%c0_17, %c0_18, %c0_19, %c0_20, %c0_21] : memref<1x6x10x10x128xbf16, #tpu.memory_space<vmem>>, vector<1x6x10x10x128xbf16>
    %37 = vector.shape_cast %36 : vector<1x6x10x10x128xbf16> to vector<6x10x10x128xbf16>
    %38 = vector.shape_cast %35 : vector<6x10x10x128xbf16> to vector<1x6x10x10x128xbf16>
    tpu.vector_store %arg8[%c0_17, %c0_18, %c0_19, %c0_20, %c0_21], %38 {strides = array<i32>} : memref<1x6x10x10x128xbf16, #tpu.memory_space<vmem>>, vector<1x6x10x10x128xbf16>,
    return
  }
  func.func @transform_0(%arg0: i32) -> (i32, i32, i32) {
    %c0_i32 = arith.constant 0 : i32
    %c0_i32_0 = arith.constant 0 : i32
    %c0_i32_1 = arith.constant 0 : i32
    return %arg0, %c0_i32, %c0_i32_0 : i32, i32, i32
  }
  func.func @transform_1(%arg0: i32) -> (i32, i32) {
    %c0_i32 = arith.constant 0 : i32
    %c0_i32_0 = arith.constant 0 : i32
    %c0_i32_1 = arith.constant 0 : i32
    return %c0_i32, %c0_i32_0 : i32, i32
  }
  func.func @transform_2(%arg0: i32) -> (i32, i32) {
    %c0_i32 = arith.constant 0 : i32
    %c0_i32_0 = arith.constant 0 : i32
    %c0_i32_1 = arith.constant 0 : i32
    return %c0_i32, %c0_i32_0 : i32, i32
  }
  func.func @transform_3(%arg0: i32) -> (i32, i32) {
    %c0_i32 = arith.constant 0 : i32
    %c0_i32_0 = arith.constant 0 : i32
    %c0_i32_1 = arith.constant 0 : i32
    return %c0_i32, %c0_i32_0 : i32, i32
  }
  func.func @transform_4(%arg0: i32) -> (i32, i32) {
    %c0_i32 = arith.constant 0 : i32
    %c0_i32_0 = arith.constant 0 : i32
    %c0_i32_1 = arith.constant 0 : i32
    return %c0_i32, %c0_i32_0 : i32, i32
  }
  func.func @transform_5(%arg0: i32) -> (i32, i32) {
    %c0_i32 = arith.constant 0 : i32
    %c0_i32_0 = arith.constant 0 : i32
    %c0_i32_1 = arith.constant 0 : i32
    return %c0_i32, %c0_i32_0 : i32, i32
  }
  func.func @transform_6(%arg0: i32) -> (i32, i32) {
    %c0_i32 = arith.constant 0 : i32
    %c0_i32_0 = arith.constant 0 : i32
    %c0_i32_1 = arith.constant 0 : i32
    return %c0_i32, %c0_i32_0 : i32, i32
  }
  func.func @transform_7(%arg0: i32) -> (i32, i32, i32, i32, i32) {
    %c0_i32 = arith.constant 0 : i32
    %c0_i32_0 = arith.constant 0 : i32
    %c0_i32_1 = arith.constant 0 : i32
    %c0_i32_2 = arith.constant 0 : i32
    %c0_i32_3 = arith.constant 0 : i32
    return %arg0, %c0_i32, %c0_i32_0, %c0_i32_1, %c0_i32_2 : i32, i32, i32, i32, i32
  }
}

</mosaic_0001>

<bundles_post_ra>
// kernel: tpu_custom_call.1
= control target key start
LH: loop header
LB: loop body
LE: loop exit
PB: predicated region body
PF: predicated region fallthrough
CT: control target
= control target key end

     0   :  { %s2485_s24 = smov 0   ;;  %s4017_s0 = inlined_call_operand.vmem [shape: f32[2,256,3], index: 0, kind: input, shape index: {}]   ;;  %s4018_s1 = inlined_call_operand.vmem [shape: f32[3,640], index: 1, kind: input, shape index: {}]   ;;  %s4019_s2 = inlined_call_operand.vmem [shape: f32[1,640], index: 2, kind: input, shape index: {}]   ;;  %s4020_s3 = inlined_call_operand.vmem [shape: f32[1,128], index: 3, kind: input, shape index: {}]   ;;  %s4021_s4 = inlined_call_operand.vmem [shape: f32[1,128], index: 4, kind: input, shape index: {}]   ;;  %s4022_s5 = inlined_call_operand.vmem [shape: f32[1,128], index: 5, kind: input, shape index: {}]   ;;  %s4023_s6 = inlined_call_operand.vmem [shape: f32[1,128], index: 6, kind: input, shape index: {}]   ;;  %s4024_s7 = inlined_call_operand.vmem [shape: bf16[2,6,10,10,128], index: 7, kind: output, shape index: {}]  }
   0x1 LB: > { %s2085_s25 = sadd.s32 4294967295, %s2440_s24   ;;  %p2089_p0 = scmp.ge.s32.totalorder %s2440_s24, 1  ;;  %s2440_s24 = sphi %s2485_s24, %s17_s24  }
   0x2   : > { %p237_p1 = scmp.lt.s32.totalorder %s2440_s24, 3 }
   0x4   : > { %p238_p2 = pnand %p2089_p0, %p237_p1 }
   0x6   : > { %241 = sbr.rel (%p238_p2) target bundleno = 461 (0x1cd), region = 48 }
   0xd   : > { %v312_v0 = vld [vmem:[%s4018_s1] sm:$0x77]  ;;  %vm444_vm0 = vcmask 1042432   ;;  %v313_v1 = vld [vmem:[%s4018_s1 + $0x8] sm:$0x77]  ;;  %v2442_v3 = vmov 0.0   ;;  %v317_v58 = vlaneseq }
   0xe   : > { %v345_v2 = vcombine.high %v312_v0, %v312_v0  ;;  %519 = vmatprep.mubr.f32.mxu0 %v2442_v3  ;;  %663 = vmatprep.mubr.f32.mxu1 %v2442_v3  ;;  %v346_v4 = vcombine.high %v313_v1, %v313_v1  ;;  %p269_p3 = scmp.lt.s32.totalorder %s2085_s25, 1  ;;  %v314_v5 = vld [vmem:[%s4018_s1 + $0x10] sm:$0x7]  ;;  %vm347_vm1 = vcmask 23552   ;;  %vm1574_vm2 = vcmask 1040384  }
   0xf   : > { %v2881_v63 = vshrl.u32 %v317_v58, 7 }
  0x10   : > { %2093 = vmatprep.subr.msk.mxu0 %vm444_vm0, %v345_v2  ;;  %2416 = vmatprep.subr.msk.mxu1 %vm444_vm0, %v345_v2  ;;  %s4112_s25 = smov (!%p269_p3, %s2085_s25), 1 }
  0x11   : > { %2094 = vmatpush1.msk.msra.mxu0 %vm444_vm0, %v312_v0  ;;  %2417 = vmatpush1.msk.msra.mxu1 %vm444_vm0, %v312_v0  ;;  %s2268_s9 = sshll.u32 %s4112_s25, 8  ;;  %s2418_s19 = smul.u32 480, %s4112_s25 }
  0x12   : > { %2127 = vmatprep.subr.msk.mxu1 %vm444_vm0, %v346_v4  ;;  %2366 = vmatprep.subr.msk.mxu0 %vm444_vm0, %v314_v5  ;;  %s2516_s12 = scalar_lea.vmem %s4017_s0, %s2268_s9  ;;  %v323_v4 = vsub.s32 1, %v2881_v63 }
  0x13   : > { %v2519_v6 = vld [vmem:[%s2516_s12] sm:$0xff]  ;;  %v2531_v8 = vld [vmem:[%s2516_s12 + $0x8] sm:$0xff]  ;;  %v2545_v10 = vld [vmem:[%s2516_s12 + $0x10] sm:$0xff]  ;;  %s3171_s22 = scalar_lea.vmem %s4024_s7, %s2418_s19 }
  0x14   : > { %v2522_v7 = vld [vmem:[%s2516_s12 + $0xc0] sm:$0xff]  ;;  %2095 = vmatmul.mubr.msk.f32.vlgmr.msra.gmra.mrb[0].mxu0 %vm347_vm1, %v2519_v6  ;;  %v2534_v9 = vld [vmem:[%s2516_s12 + $0xc8] sm:$0xff]  ;;  %v2548_v11 = vld [vmem:[%s2516_s12 + $0xd0] sm:$0xff] }
  0x15   : > { %2119 = vmatmul.mubr.msk.f32.vlgmr.msra.gmra.mrb[0].mxu1 %vm347_vm1, %v2522_v7  ;;  %2367 = vmatpush3.msk.msra.mxu0 %vm444_vm0, %v314_v5  ;;  %v2557_v12 = vld [vmem:[%s2516_s12 + $0x18] sm:$0xff]  ;;  %v2569_v14 = vld [vmem:[%s2516_s12 + $0x20] sm:$0xff]  ;;  %v2581_v16 = vld [vmem:[%s2516_s12 + $0x28] sm:$0xff]  ;;  %v331_v5 = vsub.s32 3, %v2881_v63 }
  0x16   : > { %2128 = vmatpush1.msk.msra.mxu1 %vm444_vm0, %v313_v1  ;;  %525 = vmatprep.mubr.f32.mxu0 %v2442_v3  ;;  %v2560_v13 = vld [vmem:[%s2516_s12 + $0xd8] sm:$0xff]  ;;  %v2572_v15 = vld [vmem:[%s2516_s12 + $0xe0] sm:$0xff]  ;;  %v2584_v17 = vld [vmem:[%s2516_s12 + $0xe8] sm:$0xff] }
  0x17   : > { %669 = vmatprep.mubr.f32.mxu1 %v2442_v3  ;;  %v2593_v18 = vld [vmem:[%s2516_s12 + $0x30] sm:$0xff]  ;;  %v2605_v20 = vld [vmem:[%s2516_s12 + $0x38] sm:$0xff]  ;;  %v2617_v22 = vld [vmem:[%s2516_s12 + $0x40] sm:$0xff] }
  0x18   : > { %2096 = vmatmul.mubr.msk.f32.gmra.mrb[2].mxu0 %vm347_vm1, %v2531_v8  ;;  %v2596_v19 = vld [vmem:[%s2516_s12 + $0xf0] sm:$0xff]  ;;  %v2608_v21 = vld [vmem:[%s2516_s12 + $0xf8] sm:$0xff]  ;;  %v2626_v23 = vld [vmem:[%s2516_s12 + $0x48] sm:$0xff] }
  0x19   : > { %2120 = vmatmul.mubr.msk.f32.gmra.mrb[2].mxu1 %vm347_vm1, %v2534_v9  ;;  %531 = vmatprep.mubr.f32.mxu0 %v2442_v3  ;;  %v2635_v24 = vld [vmem:[%s2516_s12 + $0x50] sm:$0xff]  ;;  %v2644_v25 = vld [vmem:[%s2516_s12 + $0x58] sm:$0xff]  ;;  %v2653_v26 = vld [vmem:[%s2516_s12 + $0x60] sm:$0xff] }
  0x1a   : > { %675 = vmatprep.mubr.f32.mxu1 %v2442_v3  ;;  %v2662_v27 = vld [vmem:[%s2516_s12 + $0x68] sm:$0xff]  ;;  %v2671_v28 = vld [vmem:[%s2516_s12 + $0x70] sm:$0xff]  ;;  %v2680_v29 = vld [vmem:[%s2516_s12 + $0x78] sm:$0xff] }
  0x1b   : > { %v2689_v30 = vld [vmem:[%s2516_s12 + $0x80] sm:$0xff]  ;;  %v2698_v31 = vld [vmem:[%s2516_s12 + $0x88] sm:$0xff]  ;;  %v2707_v32 = vld [vmem:[%s2516_s12 + $0x90] sm:$0xff] }
  0x1c   : > { %2097 = vmatmul.mubr.msk.f32.gmra.mrb[4].mxu0 %vm347_vm1, %v2545_v10  ;;  %v299_v33 = vld [vmem:[%s2516_s12 + $0x98] sm:$0xff]  ;;  %v300_v34 = vld [vmem:[%s2516_s12 + $0xa0] sm:$0xff]  ;;  %v301_v35 = vld [vmem:[%s2516_s12 + $0xa8] sm:$0xff] }
  0x1d   : > { %2121 = vmatmul.mubr.msk.f32.gmra.mrb[4].mxu1 %vm347_vm1, %v2548_v11  ;;  %537 = vmatprep.mubr.f32.mxu0 %v2442_v3  ;;  %v302_v36 = vld [vmem:[%s2516_s12 + $0xb0] sm:$0xff]  ;;  %v303_v37 = vld [vmem:[%s2516_s12 + $0xb8] sm:$0xff] }
  0x1e   : > { %681 = vmatprep.mubr.f32.mxu1 %v2442_v3 }
  0x20   : > { %2098 = vmatmul.mubr.msk.f32.gmra.mrb[6].mxu0 %vm347_vm1, %v2557_v12 }
  0x21   : > { %2122 = vmatmul.mubr.msk.f32.gmra.mrb[6].mxu1 %vm347_vm1, %v2560_v13  ;;  %543 = vmatprep.mubr.f32.mxu0 %v2442_v3 }
  0x22   : > { %687 = vmatprep.mubr.f32.mxu1 %v2442_v3 }
  0x24   : > { %2099 = vmatmul.mubr.msk.f32.gmra.mrb[8].mxu0 %vm347_vm1, %v2569_v14 }
  0x25   : > { %2123 = vmatmul.mubr.msk.f32.gmra.mrb[8].mxu1 %vm347_vm1, %v2572_v15  ;;  %549 = vmatprep.mubr.f32.mxu0 %v2442_v3 }
  0x26   : > { %693 = vmatprep.mubr.f32.mxu1 %v2442_v3 }
  0x28   : > { %2100 = vmatmul.mubr.msk.f32.gmra.mrb[10].mxu0 %vm347_vm1, %v2581_v16 }
  0x29   : > { %2124 = vmatmul.mubr.msk.f32.gmra.mrb[10].mxu1 %vm347_vm1, %v2584_v17  ;;  %555 = vmatprep.mubr.f32.mxu0 %v2442_v3 }
  0x2a   : > { %699 = vmatprep.mubr.f32.mxu1 %v2442_v3 }
  0x2c   : > { %2101 = vmatmul.mubr.msk.f32.gmra.mrb[12].mxu0 %vm347_vm1, %v2593_v18 }
  0x2d   : > { %2125 = vmatmul.mubr.msk.f32.gmra.mrb[12].mxu1 %vm347_vm1, %v2596_v19  ;;  %561 = vmatprep.mubr.f32.mxu0 %v2442_v3 }
  0x2e   : > { %705 = vmatprep.mubr.f32.mxu1 %v2442_v3 }
  0x30   : > { %2102 = vmatmul.mubr.msk.f32.gmra.mrb[14].mxu0 %vm347_vm1, %v2605_v20 }
  0x31   : > { %2126 = vmatmul.mubr.msk.f32.gmra.mrb[14].mxu1 %vm347_vm1, %v2608_v21  ;;  %567 = vmatprep.mubr.f32.mxu0 %v2442_v3 }
  0x32   : > { %776 = vmatprep.mubr.f32.mxu1 %v2442_v3 }
  0x34   : > { %2103 = vmatmul.mubr.msk.f32.gmra.mrb[16].mxu0 %vm347_vm1, %v2617_v22 }
  0x35   : > { %2129 = vmatmul.mubr.msk.f32.vlgmr.msra.gmra.mrb[16].mxu1 %vm347_vm1, %v2519_v6  ;;  %573 = vmatprep.mubr.f32.mxu0 %v2442_v3 }
  0x36   : > { %782 = vmatprep.mubr.f32.mxu1 %v2442_v3 }
  0x38   : > { %2104 = vmatmul.mubr.msk.f32.gmra.mrb[18].mxu0 %vm347_vm1, %v2626_v23 }
  0x39   : > { %2130 = vmatmul.mubr.msk.f32.gmra.mrb[18].mxu1 %vm347_vm1, %v2531_v8  ;;  %579 = vmatprep.mubr.f32.mxu0 %v2442_v3 }
  0x3a   : > { %788 = vmatprep.mubr.f32.mxu1 %v2442_v3 }
  0x3c   : > { %2105 = vmatmul.mubr.msk.f32.gmra.mrb[20].mxu0 %vm347_vm1, %v2635_v24 }
  0x3d   : > { %2131 = vmatmul.mubr.msk.f32.gmra.mrb[20].mxu1 %vm347_vm1, %v2545_v10  ;;  %585 = vmatprep.mubr.f32.mxu0 %v2442_v3 }
  0x3e   : > { %794 = vmatprep.mubr.f32.mxu1 %v2442_v3 }
  0x40   : > { %2106 = vmatmul.mubr.msk.f32.gmra.mrb[22].mxu0 %vm347_vm1, %v2644_v25 }
  0x41   : > { %2132 = vmatmul.mubr.msk.f32.gmra.mrb[22].mxu1 %vm347_vm1, %v2557_v12  ;;  %591 = vmatprep.mubr.f32.mxu0 %v2442_v3 }
  0x42   : > { %800 = vmatprep.mubr.f32.mxu1 %v2442_v3 }
  0x44   : > { %2107 = vmatmul.mubr.msk.f32.gmra.mrb[24].mxu0 %vm347_vm1, %v2653_v26 }
  0x45   : > { %2133 = vmatmul.mubr.msk.f32.gmra.mrb[24].mxu1 %vm347_vm1, %v2569_v14  ;;  %597 = vmatprep.mubr.f32.mxu0 %v2442_v3 }
  0x46   : > { %806 = vmatprep.mubr.f32.mxu1 %v2442_v3 }
  0x48   : > { %2108 = vmatmul.mubr.msk.f32.gmra.mrb[26].mxu0 %vm347_vm1, %v2662_v27 }
  0x49   : > { %2134 = vmatmul.mubr.msk.f32.gmra.mrb[26].mxu1 %vm347_vm1, %v2581_v16  ;;  %603 = vmatprep.mubr.f32.mxu0 %v2442_v3 }
  0x4a   : > { %812 = vmatprep.mubr.f32.mxu1 %v2442_v3 }
  0x4c   : > { %2109 = vmatmul.mubr.msk.f32.gmra.mrb[28].mxu0 %vm347_vm1, %v2671_v28 }
  0x4d   : > { %2135 = vmatmul.mubr.msk.f32.gmra.mrb[28].mxu1 %vm347_vm1, %v2593_v18  ;;  %609 = vmatprep.mubr.f32.mxu0 %v2442_v3 }
  0x4e   : > { %818 = vmatprep.mubr.f32.mxu1 %v2442_v3 }
  0x50   : > { %2110 = vmatmul.mubr.msk.f32.gmra.mrb[30].mxu0 %vm347_vm1, %v2680_v29 }
  0x51   : > { %2136 = vmatmul.mubr.msk.f32.gmra.mrb[30].mxu1 %vm347_vm1, %v2605_v20  ;;  %615 = vmatprep.mubr.f32.mxu0 %v2442_v3 }
  0x52   : > { %824 = vmatprep.mubr.f32.mxu1 %v2442_v3 }
  0x54   : > { %2111 = vmatmul.mubr.msk.f32.gmra.mrb[32].mxu0 %vm347_vm1, %v2689_v30 }
  0x55   : > { %2137 = vmatmul.mubr.msk.f32.gmra.mrb[32].mxu1 %vm347_vm1, %v2617_v22  ;;  %621 = vmatprep.mubr.f32.mxu0 %v2442_v3 }
  0x56   : > { %830 = vmatprep.mubr.f32.mxu1 %v2442_v3 }
  0x58   : > { %2112 = vmatmul.mubr.msk.f32.gmra.mrb[34].mxu0 %vm347_vm1, %v2698_v31 }
  0x59   : > { %2138 = vmatmul.mubr.msk.f32.gmra.mrb[34].mxu1 %vm347_vm1, %v2626_v23  ;;  %627 = vmatprep.mubr.f32.mxu0 %v2442_v3 }
  0x5a   : > { %836 = vmatprep.mubr.f32.mxu1 %v2442_v3 }
  0x5c   : > { %2113 = vmatmul.mubr.msk.f32.gmra.mrb[36].mxu0 %vm347_vm1, %v2707_v32 }
  0x5d   : > { %2139 = vmatmul.mubr.msk.f32.gmra.mrb[36].mxu1 %vm347_vm1, %v2635_v24  ;;  %633 = vmatprep.mubr.f32.mxu0 %v2442_v3 }
  0x5e   : > { %842 = vmatprep.mubr.f32.mxu1 %v2442_v3 }
  0x60   : > { %2114 = vmatmul.mubr.msk.f32.gmra.mrb[38].mxu0 %vm347_vm1, %v299_v33 }
  0x61   : > { %2140 = vmatmul.mubr.msk.f32.gmra.mrb[38].mxu1 %vm347_vm1, %v2644_v25  ;;  %639 = vmatprep.mubr.f32.mxu0 %v2442_v3 }
  0x62   : > { %848 = vmatprep.mubr.f32.mxu1 %v2442_v3 }
  0x64   : > { %2115 = vmatmul.mubr.msk.f32.gmra.mrb[40].mxu0 %vm347_vm1, %v300_v34 }
  0x65   : > { %2141 = vmatmul.mubr.msk.f32.gmra.mrb[40].mxu1 %vm347_vm1, %v2653_v26  ;;  %645 = vmatprep.mubr.f32.mxu0 %v2442_v3 }
  0x66   : > { %854 = vmatprep.mubr.f32.mxu1 %v2442_v3 }
  0x68   : > { %2116 = vmatmul.mubr.msk.f32.gmra.mrb[42].mxu0 %vm347_vm1, %v301_v35 }
  0x69   : > { %2142 = vmatmul.mubr.msk.f32.gmra.mrb[42].mxu1 %vm347_vm1, %v2662_v27  ;;  %651 = vmatprep.mubr.f32.mxu0 %v2442_v3 }
  0x6a   : > { %860 = vmatprep.mubr.f32.mxu1 %v2442_v3 }
  0x6c   : > { %2117 = vmatmul.mubr.msk.f32.gmra.mrb[44].mxu0 %vm347_vm1, %v302_v36 }
  0x6d   : > { %2143 = vmatmul.mubr.msk.f32.gmra.mrb[44].mxu1 %vm347_vm1, %v2671_v28  ;;  %657 = vmatprep.mubr.f32.mxu0 %v2442_v3 }
  0x6e   : > { %866 = vmatprep.mubr.f32.mxu1 %v2442_v3 }
  0x70   : > { %2118 = vmatmul.mubr.msk.f32.gmra.mrb[46].mxu0 %vm347_vm1, %v303_v37 }
  0x71   : > { %2144 = vmatmul.mubr.msk.f32.gmra.mrb[46].mxu1 %vm347_vm1, %v2680_v29  ;;  %2368 = vmatprep.mubr.msk.f32.mxu0 %vm347_vm1, %v2519_v6  ;;  %v2894_v6 = vld [vmem:[%s4019_s2] sm:$0x1f] }
  0x72   : > { %872 = vmatprep.mubr.f32.mxu1 %v2442_v3 }
  0x74   : > { %2369 = vmatmul.mubr.msk.f32.vlgmr.msra.gmra.mrb[48].mxu0 %vm347_vm1, %v2531_v8 }
  0x75   : > { %2145 = vmatmul.mubr.msk.f32.gmra.mrb[48].mxu1 %vm347_vm1, %v2689_v30  ;;  %2371 = vmatprep.mubr.msk.f32.mxu0 %vm347_vm1, %v2545_v10 }
  0x76   : > { %878 = vmatprep.mubr.f32.mxu1 %v2442_v3 }
  0x78   : > { %2372 = vmatmul.mubr.msk.f32.gmra.mrb[50].mxu0 %vm347_vm1, %v2557_v12  ;;  %v2908_v12 = vrot.slane %v2894_v6, %v331_v5 }
  0x79   : > { %2146 = vmatmul.mubr.msk.f32.gmra.mrb[50].mxu1 %vm347_vm1, %v2698_v31  ;;  %2374 = vmatprep.mubr.msk.f32.mxu0 %vm347_vm1, %v2569_v14 }
  0x7a   : > { %884 = vmatprep.mubr.f32.mxu1 %v2442_v3 }
  0x7c   : > { %2375 = vmatmul.mubr.msk.f32.gmra.mrb[52].mxu0 %vm347_vm1, %v2581_v16 }
  0x7d   : > { %2147 = vmatmul.mubr.msk.f32.gmra.mrb[52].mxu1 %vm347_vm1, %v2707_v32  ;;  %2377 = vmatprep.mubr.msk.f32.mxu0 %vm347_vm1, %v2593_v18 }
  0x7e   : > { %890 = vmatprep.mubr.f32.mxu1 %v2442_v3 }
  0x80   : > { %2378 = vmatmul.mubr.msk.f32.gmra.mrb[54].mxu0 %vm347_vm1, %v2605_v20 }
  0x81   : > { %2148 = vmatmul.mubr.msk.f32.gmra.mrb[54].mxu1 %vm347_vm1, %v299_v33  ;;  %2380 = vmatprep.mubr.msk.f32.mxu0 %vm347_vm1, %v2617_v22 }
  0x82   : > { %896 = vmatprep.mubr.f32.mxu1 %v2442_v3 }
  0x84   : > { %2381 = vmatmul.mubr.msk.f32.gmra.mrb[56].mxu0 %vm347_vm1, %v2626_v23 }
  0x85   : > { %2149 = vmatmul.mubr.msk.f32.gmra.mrb[56].mxu1 %vm347_vm1, %v300_v34  ;;  %2383 = vmatprep.mubr.msk.f32.mxu0 %vm347_vm1, %v2635_v24 }
  0x86   : > { %902 = vmatprep.mubr.f32.mxu1 %v2442_v3 }
  0x88   : > { %2384 = vmatmul.mubr.msk.f32.gmra.mrb[58].mxu0 %vm347_vm1, %v2644_v25 }
  0x89   : > { %2150 = vmatmul.mubr.msk.f32.gmra.mrb[58].mxu1 %vm347_vm1, %v301_v35  ;;  %2386 = vmatprep.mubr.msk.f32.mxu0 %vm347_vm1, %v2653_v26 }
  0x8a   : > { %908 = vmatprep.mubr.f32.mxu1 %v2442_v3 }
  0x8c   : > { %2387 = vmatmul.mubr.msk.f32.gmra.mrb[60].mxu0 %vm347_vm1, %v2662_v27 }
  0x8d   : > { %2151 = vmatmul.mubr.msk.f32.gmra.mrb[60].mxu1 %vm347_vm1, %v302_v36  ;;  %2389 = vmatprep.mubr.msk.f32.mxu0 %vm347_vm1, %v2671_v28 }
  0x8e   : > { %914 = vmatprep.mubr.f32.mxu1 %v2442_v3 }
  0x90   : > { %2390 = vmatmul.mubr.msk.f32.gmra.mrb[62].mxu0 %vm347_vm1, %v2680_v29 }
  0x91   : > { %2152 = vmatmul.mubr.msk.f32.gmra.mrb[62].mxu1 %vm347_vm1, %v303_v37  ;;  %2392 = vmatprep.mubr.msk.f32.mxu0 %vm347_vm1, %v2689_v30 }
  0x92   : > { %920 = vmatprep.mubr.f32.mxu1 %v2442_v3 }
  0x94   : > { %2393 = vmatmul.mubr.msk.f32.gmra.mrb[64].mxu0 %vm347_vm1, %v2698_v31 }
  0x95   : > { %2153 = vmatmul.mubr.msk.f32.gmra.mrb[64].mxu1 %vm347_vm1, %v2522_v7  ;;  %2395 = vmatprep.mubr.msk.f32.mxu0 %vm347_vm1, %v2707_v32 }
  0x96   : > { %926 = vmatprep.mubr.f32.mxu1 %v2442_v3 }
  0x98   : > { %2396 = vmatmul.mubr.msk.f32.gmra.mrb[66].mxu0 %vm347_vm1, %v299_v33 }
  0x99   : > { %2154 = vmatmul.mubr.msk.f32.gmra.mrb[66].mxu1 %vm347_vm1, %v2534_v9  ;;  %2398 = vmatprep.mubr.msk.f32.mxu0 %vm347_vm1, %v300_v34 }
  0x9a   : > { %932 = vmatprep.mubr.f32.mxu1 %v2442_v3 }
  0x9c   : > { %2399 = vmatmul.mubr.msk.f32.gmra.mrb[68].mxu0 %vm347_vm1, %v301_v35 }
  0x9d   : > { %2155 = vmatmul.mubr.msk.f32.gmra.mrb[68].mxu1 %vm347_vm1, %v2548_v11  ;;  %2401 = vmatprep.mubr.msk.f32.mxu0 %vm347_vm1, %v302_v36 }
  0x9e   : > { %938 = vmatprep.mubr.f32.mxu1 %v2442_v3 }
  0xa0   : > { %2402 = vmatmul.mubr.msk.f32.gmra.mrb[70].mxu0 %vm347_vm1, %v303_v37 }
  0xa1   : > { %2156 = vmatmul.mubr.msk.f32.gmra.mrb[70].mxu1 %vm347_vm1, %v2560_v13  ;;  %2404 = vmatprep.mubr.msk.f32.mxu0 %vm347_vm1, %v2522_v7 }
  0xa2   : > { %944 = vmatprep.mubr.f32.mxu1 %v2442_v3 }
  0xa4   : > { %2405 = vmatmul.mubr.msk.f32.gmra.mrb[72].mxu0 %vm347_vm1, %v2534_v9 }
  0xa5   : > { %2157 = vmatmul.mubr.msk.f32.gmra.mrb[72].mxu1 %vm347_vm1, %v2572_v15  ;;  %2407 = vmatprep.mubr.msk.f32.mxu0 %vm347_vm1, %v2548_v11  ;;  %v2905_v11 = vrot.slane %v2894_v6, %v323_v4 }
  0xa6   : > { %950 = vmatprep.mubr.f32.mxu1 %v2442_v3 }
  0xa8   : > { %2408 = vmatmul.mubr.msk.f32.gmra.mrb[74].mxu0 %vm347_vm1, %v2560_v13 }
  0xa9   : > { %2158 = vmatmul.mubr.msk.f32.gmra.mrb[74].mxu1 %vm347_vm1, %v2584_v17  ;;  %2410 = vmatprep.mubr.msk.f32.mxu0 %vm347_vm1, %v2572_v15 }
  0xaa   : > { %956 = vmatprep.mubr.f32.mxu1 %v2442_v3 }
  0xac   : > { %2411 = vmatmul.mubr.msk.f32.gmra.mrb[76].mxu0 %vm347_vm1, %v2584_v17 }
  0xad   : > { %2159 = vmatmul.mubr.msk.f32.gmra.mrb[76].mxu1 %vm347_vm1, %v2596_v19  ;;  %2413 = vmatprep.mubr.msk.f32.mxu0 %vm347_vm1, %v2596_v19 }
  0xae   : > { %962 = vmatprep.mubr.f32.mxu1 %v2442_v3 }
  0xb0   : > { %2414 = vmatmul.mubr.msk.f32.gmra.mrb[78].mxu0 %vm347_vm1, %v2608_v21 }
  0xb1   : > { %2160 = vmatmul.mubr.msk.f32.gmra.mrb[78].mxu1 %vm347_vm1, %v2608_v21 }
  0xe7   : > { %v2845_v38 = vpop.f32.mrb[0].mxu0 }
  0xe8   : > { %v2847_v39 = vpop.f32.mrb[0].mxu1  ;;  %v523_v40 = vpop.f32.mrb[1].mxu0 }
  0xe9   : > { %v2849_v41 = vpop.f32.mrb[1].mxu1  ;;  %v524_v17 = vadd.f32 %v523_v40, %v2905_v11 }
  0xeb   : > { %v2851_v42 = vpop.f32.mrb[2].mxu0 }
  0xec   : > { %v2853_v43 = vpop.f32.mrb[2].mxu1  ;;  %v529_v44 = vpop.f32.mrb[3].mxu0 }
  0xed   : > { %v2855_v45 = vpop.f32.mrb[3].mxu1  ;;  %v530_v24 = vadd.f32 %v529_v44, %v2905_v11 }
  0xef   : > { %v2857_v46 = vpop.f32.mrb[4].mxu0 }
  0xf0   : > { %v2859_v47 = vpop.f32.mrb[4].mxu1  ;;  %v535_v48 = vpop.f32.mrb[5].mxu0 }
  0xf1   : > { %v2861_v49 = vpop.f32.mrb[5].mxu1  ;;  %v536_v31 = vadd.f32 %v535_v48, %v2905_v11 }
  0xf3   : > { %v2863_v50 = vpop.f32.mrb[6].mxu0 }
  0xf4   : > { %v2865_v51 = vpop.f32.mrb[6].mxu1  ;;  %v541_v52 = vpop.f32.mrb[7].mxu0 }
  0xf5   : > { %v2867_v53 = vpop.f32.mrb[7].mxu1  ;;  %v542_v40 = vadd.f32 %v541_v52, %v2905_v11 }
  0xf7   : > { %v2869_v54 = vpop.f32.mrb[8].mxu0 }
  0xf8   : > { %v2871_v55 = vpop.f32.mrb[8].mxu1  ;;  %v547_v56 = vpop.f32.mrb[9].mxu0 }
  0xf9   : > { %v2873_v57 = vpop.f32.mrb[9].mxu1 }
  0xfb   : > { %v2875_v59 = vpop.f32.mrb[10].mxu0 }
  0xfc   : > { %v2877_v60 = vpop.f32.mrb[10].mxu1  ;;  %v553_v61 = vpop.f32.mrb[11].mxu0 }
  0xfd   : > { %v2879_v62 = vpop.f32.mrb[11].mxu1 }
  0xff   : > { %v2883_v0 = vpop.f32.mrb[12].mxu0 }
 0x100   : > { %v2885_v1 = vpop.f32.mrb[12].mxu1  ;;  %v559_v2 = vpop.f32.mrb[13].mxu0 }
 0x101   : > { %v2887_v3 = vpop.f32.mrb[13].mxu1 }
 0x103   : > { %v2896_v7 = vpop.f32.mrb[14].mxu0 }
 0x104   : > { %v2898_v8 = vpop.f32.mrb[14].mxu1  ;;  %v2900_v9 = vpop.f32.mrb[15].mxu0 }
 0x105   : > { %v2902_v10 = vpop.f32.mrb[15].mxu1 }
 0x107   : > { %v2910_v13 = vpop.f32.mrb[16].mxu0 }
 0x108   : > { %v2912_v14 = vpop.f32.mrb[16].mxu1  ;;  %v2914_v15 = vpop.f32.mrb[17].mxu0 }
 0x109   : > { %v780_v16 = vpop.f32.mrb[17].mxu1 }
 0x10a   : > { %v781_v18 = vadd.f32 %v780_v16, %v2908_v12 }
 0x10b   : > { %v2920_v20 = vpop.f32.mrb[18].mxu0 }
 0x10c   : > { %v2918_v19 = vmul.f32 %v781_v18, %v524_v17  ;;  %v2922_v21 = vpop.f32.mrb[18].mxu1  ;;  %v2924_v22 = vpop.f32.mrb[19].mxu0  ;;  %v548_v17 = vadd.f32 %v547_v56, %v2905_v11 }
 0x10d   : > { %v786_v23 = vpop.f32.mrb[19].mxu1 }
 0x10e   : > { %4025 = vst [vmem:[#allocation2_spill] sm:$0xff] %v2918_v19  ;;  %v787_v25 = vadd.f32 %v786_v23, %v2908_v12  ;;  %v319_v23 = vsub.s32 0, %v2881_v63 }
 0x10f   : > { %v2930_v27 = vpop.f32.mrb[20].mxu0 }
 0x110   : > { %v2928_v26 = vmul.f32 %v787_v25, %v530_v24  ;;  %v2932_v28 = vpop.f32.mrb[20].mxu1  ;;  %v2934_v29 = vpop.f32.mrb[21].mxu0 }
 0x111   : > { %v792_v30 = vpop.f32.mrb[21].mxu1 }
 0x112   : > { %4026 = vst [vmem:[#allocation3_spill] sm:$0xff] %v2928_v26  ;;  %v793_v32 = vadd.f32 %v792_v30, %v2908_v12  ;;  %v566_v26 = vadd.f32 %v2900_v9, %v2905_v11 }
 0x113   : > { %v2940_v34 = vpop.f32.mrb[22].mxu0 }
 0x114   : > { %v2938_v33 = vmul.f32 %v793_v32, %v536_v31  ;;  %v2942_v35 = vpop.f32.mrb[22].mxu1  ;;  %v2944_v36 = vpop.f32.mrb[23].mxu0  ;;  %v554_v32 = vadd.f32 %v553_v61, %v2905_v11 }
 0x115   : > { %v798_v37 = vpop.f32.mrb[23].mxu1 }
 0x116   : > { %4027 = vst [vmem:[#allocation4_spill] sm:$0xff] %v2938_v33  ;;  %v799_v44 = vadd.f32 %v798_v37, %v2908_v12 }
 0x117   : > { %v2950_v4 = vpop.f32.mrb[24].mxu0 }
 0x118   : > { %v2948_v58 = vmul.f32 %v799_v44, %v542_v40  ;;  %v2952_v48 = vpop.f32.mrb[24].mxu1  ;;  %v2954_v5 = vpop.f32.mrb[25].mxu0  ;;  %v2970_v40 = vrot.slane %v2894_v6, %v319_v23 }
 0x119   : > { %v804_v16 = vpop.f32.mrb[25].mxu1 }
 0x11a   : > { %4028 = vst [vmem:[#allocation5_spill] sm:$0xff] %v2948_v58  ;;  %v805_v18 = vadd.f32 %v804_v16, %v2908_v12  ;;  %v522_v61 = vadd.f32 %v2845_v38, %v2970_v40  ;;  %v666_v23 = vadd.f32 %v2847_v39, %v2970_v40  ;;  %v528_v38 = vadd.f32 %v2851_v42, %v2970_v40 }
 0x11b   : > { %v2961_v52 = vpop.f32.mrb[26].mxu0  ;;  %v672_v39 = vadd.f32 %v2853_v43, %v2970_v40  ;;  %v3018_v43 = vld [vmem:[%s4021_s4] ss:$0 sm:$0xff]  ;;  %v678_v9 = vadd.f32 %v2859_v47, %v2970_v40  ;;  %v546_v47 = vadd.f32 %v2869_v54, %v2970_v40 }
 0x11c   : > { %v2959_v24 = vmul.f32 %v805_v18, %v548_v17  ;;  %v2963_v25 = vpop.f32.mrb[26].mxu1  ;;  %v2965_v30 = vpop.f32.mrb[27].mxu0 }
 0x11d   : > { %v810_v31 = vpop.f32.mrb[27].mxu1 }
 0x11e   : > { %4029 = vst [vmem:[#allocation6_spill] sm:$0xff] %v2959_v24  ;;  %v811_v37 = vadd.f32 %v810_v31, %v2908_v12  ;;  %v560_v24 = vadd.f32 %v559_v2, %v2905_v11  ;;  %v327_v31 = vsub.s32 2, %v2881_v63 }
 0x11f   : > { %v2974_v44 = vpop.f32.mrb[28].mxu0 }
 0x120   : > { %v2972_v56 = vmul.f32 %v811_v37, %v554_v32  ;;  %v2976_v16 = vpop.f32.mrb[28].mxu1  ;;  %v2978_v17 = vpop.f32.mrb[29].mxu0  ;;  %v2990_v32 = vld [vmem:[%s4020_s3] ss:$0 sm:$0xff]  ;;  %v3013_v42 = vrot.slane %v2894_v6, %v327_v31 }
 0x121   : > { %4031 = vst [vmem:[#allocation8_spill] sm:$0xff] %v2978_v17  ;;  %v816_v18 = vpop.f32.mrb[29].mxu1  ;;  %v1202_v31 = vmul.f32 %v2990_v32, %v528_v38  ;;  %v684_v17 = vadd.f32 %v2865_v51, %v2970_v40 }
 0x122   : > { %4030 = vst [vmem:[#allocation7_spill] sm:$0xff] %v2972_v56  ;;  %v817_v33 = vadd.f32 %v816_v18, %v2908_v12  ;;  %v335_v18 = vsub.s32 4, %v2881_v63  ;;  %v534_v63 = vadd.f32 %v2857_v46, %v2970_v40 }
 0x123   : > { %v2994_v56 = vpop.f32.mrb[30].mxu0 }
 0x124   : > { %v2992_v37 = vmul.f32 %v817_v33, %v560_v24  ;;  %v2996_v2 = vpop.f32.mrb[30].mxu1  ;;  %v3003_v58 = vpop.f32.mrb[31].mxu0  ;;  %v1201_v24 = vmul.f32 %v2990_v32, %v522_v61  ;;  %v3031_v46 = vrot.slane %v2894_v6, %v335_v18  ;;  %v690_v6 = vadd.f32 %v2871_v55, %v2970_v40 }
 0x125   : > { %4033 = vst [vmem:[#allocation10_spill] sm:$0xff] %v2996_v2  ;;  %4034 = vst [vmem:[#allocation11_spill] sm:$0xff] %v3003_v58  ;;  %v822_v19 = vpop.f32.mrb[31].mxu1  ;;  %v1226_v2 = vmul.f32 %v2990_v32, %v672_v39  ;;  %v572_v18 = vadd.f32 %v2914_v15, %v2905_v11  ;;  %v1203_v39 = vmul.f32 %v2990_v32, %v534_v63 }
 0x126   : > { %4032 = vst [vmem:[#allocation9_spill] sm:$0xff] %v2992_v37  ;;  %v823_v33 = vadd.f32 %v822_v19, %v2908_v12  ;;  %v1225_v37 = vmul.f32 %v2990_v32, %v666_v23  ;;  %v540_v19 = vadd.f32 %v2863_v50, %v2970_v40  ;;  %v3051_v51 = vadd.f32 %v3018_v43, %v1201_v24 }
 0x127   : > { %v3026_v23 = vpop.f32.mrb[32].mxu0  ;;  %v1227_v55 = vmul.f32 %v2990_v32, %v678_v9  ;;  %v3075_v63 = vadd.f32 %v3018_v43, %v1226_v2  ;;  %v3090_v2 = vadd.f32 %v3018_v43, %v1203_v39 }
 0x128   : > { %v3024_v61 = vmul.f32 %v823_v33, %v566_v26  ;;  %v3028_v58 = vpop.f32.mrb[32].mxu1  ;;  %v3039_v50 = vpop.f32.mrb[33].mxu0  ;;  %v3043_v33 = vadd.f32 %v2849_v41, %v2905_v11  ;;  %v3054_v54 = vadd.f32 %v3018_v43, %v1225_v37  ;;  %v552_v41 = vadd.f32 %v2875_v59, %v2970_v40 }
 0x129   : > { %v828_v26 = vpop.f32.mrb[33].mxu1  ;;  %v1204_v15 = vmul.f32 %v2990_v32, %v540_v19  ;;  %v3072_v37 = vadd.f32 %v3018_v43, %v1202_v31  ;;  %4039 = vst [vmem:[#allocation16_spill] sm:$0xff] %v3075_v63  ;;  %v1228_v59 = vmul.f32 %v2990_v32, %v684_v17  ;;  %v3083_v19 = vadd.f32 %v2861_v49, %v2905_v11 }
 0x12a   : > { %4035 = vst [vmem:[#allocation12_spill] sm:$0xff] %v3024_v61  ;;  %4036 = vst [vmem:[#allocation13_spill] sm:$0xff] %v3043_v33  ;;  %v829_v38 = vadd.f32 %v828_v26, %v2908_v12  ;;  %v3061_v33 = vadd.f32 %v2855_v45, %v2905_v11  ;;  %v1205_v45 = vmul.f32 %v2990_v32, %v546_v47 }
 0x12b   : > { %4037 = vst [vmem:[#allocation14_spill] sm:$0xff] %v3054_v54  ;;  %v3067_v24 = vpop.f32.mrb[34].mxu0  ;;  %4040 = vst [vmem:[#allocation17_spill] sm:$0xff] %v3083_v19  ;;  %v578_v31 = vadd.f32 %v2924_v22, %v2905_v11  ;;  %v1206_v17 = vmul.f32 %v2990_v32, %v552_v41  ;;  %v696_v47 = vadd.f32 %v2877_v60, %v2970_v40 }
 0x12c   : > { %4038 = vst [vmem:[#allocation15_spill] sm:$0xff] %v3061_v33  ;;  %v3065_v26 = vmul.f32 %v829_v38, %v572_v18  ;;  %v3069_v61 = vpop.f32.mrb[34].mxu1  ;;  %v3079_v54 = vpop.f32.mrb[35].mxu0  ;;  %v1229_v18 = vmul.f32 %v2990_v32, %v690_v6  ;;  %v558_v49 = vadd.f32 %v2883_v0, %v2970_v40  ;;  %v3098_v63 = vadd.f32 %v3018_v43, %v1227_v55 }
 0x12d   : > { %v834_v9 = vpop.f32.mrb[35].mxu1  ;;  %v3101_v6 = vadd.f32 %v3018_v43, %v1204_v15  ;;  %v3105_v22 = vadd.f32 %v2867_v53, %v2905_v11  ;;  %v3114_v60 = vadd.f32 %v3018_v43, %v1228_v59  ;;  %v3117_v0 = vadd.f32 %v3018_v43, %v1205_v45 }
 0x12e   : > { %v835_v38 = vadd.f32 %v834_v9, %v2908_v12  ;;  %4041 = vst [vmem:[#allocation18_spill] sm:$0xff] %v3098_v63  ;;  %v3121_v55 = vadd.f32 %v2873_v57, %v2905_v11  ;;  %v564_v53 = vadd.f32 %v2896_v7, %v2970_v40  ;;  %v3133_v59 = vadd.f32 %v2879_v62, %v2905_v11 }
 0x12f   : > { %4042 = vst [vmem:[#allocation19_spill] sm:$0xff] %v3105_v22  ;;  %v3109_v9 = vpop.f32.mrb[36].mxu0  ;;  %4043 = vst [vmem:[#allocation20_spill] sm:$0xff] %v3114_v60  ;;  %v584_v45 = vadd.f32 %v2934_v29, %v2905_v11  ;;  %v3139_v63 = vadd.f32 %v3018_v43, %v1206_v17  ;;  %v3142_v7 = vmul.f32 %v2990_v32, %v696_v47 }
 0x130   : > { %v3107_v39 = vmul.f32 %v835_v38, %v578_v31  ;;  %v3111_v41 = vpop.f32.mrb[36].mxu1  ;;  %4044 = vst [vmem:[#allocation21_spill] sm:$0xff] %v3121_v55  ;;  %v3125_v15 = vpop.f32.mrb[37].mxu0  ;;  %v3129_v38 = vadd.f32 %v3018_v43, %v1229_v18  ;;  %4046 = vst [vmem:[#allocation23_spill] sm:$0xff] %v3133_v59  ;;  %v1207_v60 = vmul.f32 %v2990_v32, %v558_v49 }
 0x131   : > { %v840_v31 = vpop.f32.mrb[37].mxu1  ;;  %4047 = vst [vmem:[#allocation24_spill] sm:$0xff] %v3142_v7  ;;  %v570_v18 = vadd.f32 %v2910_v13, %v2970_v40  ;;  %v576_v62 = vadd.f32 %v2920_v20, %v2970_v40  ;;  %v3157_v17 = vadd.f32 %v2885_v1, %v2970_v40  ;;  %v3160_v47 = vmul.f32 %v2990_v32, %v564_v53 }
 0x132   : > { %4045 = vst [vmem:[#allocation22_spill] sm:$0xff] %v3129_v38  ;;  %v841_v57 = vadd.f32 %v840_v31, %v2908_v12  ;;  %v3164_v49 = vadd.f32 %v2930_v27, %v2970_v40  ;;  %v2443_v31 = vmov 0   ;;  %v590_v1 = vadd.f32 %v2944_v36, %v2905_v11 }
 0x133   : > { %v3151_v59 = vpop.f32.mrb[38].mxu0  ;;  %4048 = vst [vmem:[#allocation25_spill] sm:$0xff] %v3157_v17  ;;  %v2199_v53 = vcombine.high %v2443_v31, %v2443_v31  ;;  %v3178_v7 = vadd.f32 %v2887_v3, %v2905_v11  ;;  %v3181_v55 = vmul.f32 %v2990_v32, %v570_v18  ;;  %v3185_v36 = vadd.f32 %v2940_v34, %v2970_v40 }
 0x134   : > { %v3149_v38 = vmul.f32 %v841_v57, %v584_v45  ;;  %v3153_v29 = vpop.f32.mrb[38].mxu1  ;;  %v3166_v13 = vpop.f32.mrb[39].mxu0  ;;  %v2198_v45 = vcombine.low %v2443_v31, %v2443_v31  ;;  %v2444_v57 = vmov 0.0|0.0   ;;  %v3210_v3 = vadd.f32 %v3018_v43, %v1207_v60 }
 0x135   : > { %v846_v20 = vpop.f32.mrb[39].mxu1  ;;  %v2200_v17 = vcombine.low %v2444_v57, %v2444_v57  ;;  %4049 = vst [vmem:[#allocation26_spill] sm:$0xff] %v3178_v7  ;;  %v1210_v34 = vmul.f32 %v2990_v32, %v576_v62  ;;  %v594_v18 = vadd.f32 %v2950_v4, %v2970_v40  ;;  %1911 = vst [vmem:[%s3171_s22 + $0x4] sm:$0x1] %v2199_v53 }
 0x136   : > { %v847_v27 = vadd.f32 %v846_v20, %v2908_v12  ;;  %v3187_v20 = vcombine.high %v2444_v57, %v2444_v57  ;;  %1910 = vst [vmem:[%s3171_s22] sm:$0xf] %v2198_v45  ;;  %1912 = vst [vmem:[%s3171_s22 + $0x8] sm:$0xf] %v2198_v45  ;;  %v3251_v4 = vadd.f32 %v2898_v8, %v2970_v40 }
 0x137   : > { %1914 = vst [vmem:[%s3171_s22 + $0x10] sm:$0xf] %v2198_v45  ;;  %1916 = vst [vmem:[%s3171_s22 + $0x18] sm:$0xf] %v2198_v45  ;;  %v3217_v57 = vpop.f32.mrb[40].mxu0  ;;  %v3255_v60 = vadd.f32 %v2902_v10, %v2905_v11  ;;  %v1211_v62 = vmul.f32 %v2990_v32, %v3164_v49  ;;  %v3281_v8 = vadd.f32 %v3018_v43, %v3160_v47 }
 0x138   : > { %1918 = vst [vmem:[%s3171_s22 + $0x20] sm:$0xf] %v2198_v45  ;;  %1920 = vst [vmem:[%s3171_s22 + $0x28] sm:$0xf] %v2198_v45  ;;  %v3215_v31 = vmul.f32 %v847_v27, %v590_v1  ;;  %v3219_v7 = vpop.f32.mrb[40].mxu1  ;;  %v596_v10 = vadd.f32 %v2954_v5, %v2905_v11  ;;  %v3290_v27 = vadd.f32 %v3018_v43, %v3181_v55 }
 0x139   : > { %1922 = vst [vmem:[%s3171_s22 + $0x30] sm:$0xf] %v2198_v45  ;;  %1924 = vst [vmem:[%s3171_s22 + $0x38] sm:$0xf] %v2198_v45  ;;  %v852_v1 = vpop.f32.mrb[41].mxu1  ;;  %v3298_v47 = vadd.f32 %v2922_v21, %v3013_v42  ;;  %v1212_v5 = vmul.f32 %v2990_v32, %v3185_v36  ;;  %v612_v55 = vadd.f32 %v2994_v56, %v2970_v40 }
 0x13a   : > { %1926 = vst [vmem:[%s3171_s22 + $0x40] sm:$0xf] %v2198_v45  ;;  %1928 = vst [vmem:[%s3171_s22 + $0x48] sm:$0xf] %v2198_v45  ;;  %v853_v49 = vadd.f32 %v852_v1, %v2908_v12  ;;  %v3317_v21 = vadd.f32 %v2932_v28, %v3013_v42 }
 0x13b   : > { %2010 = vst [vmem:[%s3171_s22 + $0x190] sm:$0xf] %v2198_v45  ;;  %2012 = vst [vmem:[%s3171_s22 + $0x198] sm:$0xf] %v2198_v45  ;;  %v3331_v28 = vadd.f32 %v3018_v43, %v1212_v5  ;;  %v1216_v5 = vmul.f32 %v2990_v32, %v612_v55  ;;  %v4058_v55 = vld [vmem:[#allocation8_spill] sm:$0xff] }
 0x13c   : > { %2014 = vst [vmem:[%s3171_s22 + $0x1a0] sm:$0xf] %v2198_v45  ;;  %2016 = vst [vmem:[%s3171_s22 + $0x1a8] sm:$0xf] %v2198_v45  ;;  %v3308_v1 = vmul.f32 %v853_v49, %v596_v10  ;;  %v602_v10 = vadd.f32 %v2965_v30, %v2905_v11  ;;  %v630_v30 = vadd.f32 %v3109_v9, %v2970_v40 }
 0x13d   : > { %2018 = vst [vmem:[%s3171_s22 + $0x1b0] sm:$0xf] %v2198_v45  ;;  %2020 = vst [vmem:[%s3171_s22 + $0x1b8] sm:$0xf] %v2198_v45  ;;  %v3360_v9 = vadd.f32 %v2976_v16, %v3013_v42  ;;  %v4059_v16 = vld [vmem:[#allocation10_spill] sm:$0xff] }
 0x13e   : > { %2022 = vst [vmem:[%s3171_s22 + $0x1c0] sm:$0xf] %v2198_v45  ;;  %2024 = vst [vmem:[%s3171_s22 + $0x1c8] sm:$0xf] %v2198_v45 }
 0x13f   : > { %2026 = vst [vmem:[%s3171_s22 + $0x1d0] sm:$0xf] %v2198_v45  ;;  %2028 = vst [vmem:[%s3171_s22 + $0x1d8] sm:$0xf] %v2198_v45  ;;  %v3261_v45 = vpop.f32.mrb[41].mxu0 }
 0x140   : > { %1913 = vst [vmem:[%s3171_s22 + $0xc] sm:$0x1] %v2199_v53  ;;  %1915 = vst [vmem:[%s3171_s22 + $0x14] sm:$0x1] %v2199_v53 }
 0x141   : > { %1917 = vst [vmem:[%s3171_s22 + $0x1c] sm:$0x1] %v2199_v53  ;;  %1919 = vst [vmem:[%s3171_s22 + $0x24] sm:$0x1] %v2199_v53 }
 0x142   : > { %1921 = vst [vmem:[%s3171_s22 + $0x2c] sm:$0x1] %v2199_v53  ;;  %1923 = vst [vmem:[%s3171_s22 + $0x34] sm:$0x1] %v2199_v53 }
 0x143   : > { %1925 = vst [vmem:[%s3171_s22 + $0x3c] sm:$0x1] %v2199_v53  ;;  %1927 = vst [vmem:[%s3171_s22 + $0x44] sm:$0x1] %v2199_v53 }
 0x144   : > { %1929 = vst [vmem:[%s3171_s22 + $0x4c] sm:$0x1] %v2199_v53  ;;  %1930 = vst [vmem:[%s3171_s22 + $0x50] sm:$0xf] %v2200_v17 }
 0x145   : > { %1948 = vst [vmem:[%s3171_s22 + $0x98] sm:$0xf] %v2200_v17  ;;  %1950 = vst [vmem:[%s3171_s22 + $0xa0] sm:$0xf] %v2200_v17 }
 0x146   : > { %1968 = vst [vmem:[%s3171_s22 + $0xe8] sm:$0xf] %v2200_v17  ;;  %1970 = vst [vmem:[%s3171_s22 + $0xf0] sm:$0xf] %v2200_v17 }
 0x147   : > { %1988 = vst [vmem:[%s3171_s22 + $0x138] sm:$0xf] %v2200_v17  ;;  %1990 = vst [vmem:[%s3171_s22 + $0x140] sm:$0xf] %v2200_v17 }
 0x148   : > { %2008 = vst [vmem:[%s3171_s22 + $0x188] sm:$0xf] %v2200_v17  ;;  %2011 = vst [vmem:[%s3171_s22 + $0x194] sm:$0x1] %v2199_v53  ;;  %v600_v17 = vadd.f32 %v2961_v52, %v2970_v40  ;;  %v606_v52 = vadd.f32 %v2974_v44, %v2970_v40  ;;  %v1213_v44 = vmul.f32 %v2990_v32, %v594_v18 }
 0x149   : > { %2013 = vst [vmem:[%s3171_s22 + $0x19c] sm:$0x1] %v2199_v53  ;;  %2015 = vst [vmem:[%s3171_s22 + $0x1a4] sm:$0x1] %v2199_v53 }
 0x14a   : > { %2017 = vst [vmem:[%s3171_s22 + $0x1ac] sm:$0x1] %v2199_v53  ;;  %2019 = vst [vmem:[%s3171_s22 + $0x1b4] sm:$0x1] %v2199_v53  ;;  %v1214_v36 = vmul.f32 %v2990_v32, %v600_v17  ;;  %v1215_v49 = vmul.f32 %v2990_v32, %v606_v52  ;;  %v3335_v17 = vadd.f32 %v2942_v35, %v3013_v42 }
 0x14b   : > { %2021 = vst [vmem:[%s3171_s22 + $0x1bc] sm:$0x1] %v2199_v53  ;;  %2023 = vst [vmem:[%s3171_s22 + $0x1c4] sm:$0x1] %v2199_v53  ;;  %v3344_v52 = vadd.f32 %v3018_v43, %v1213_v44 }
 0x14c   : > { %2025 = vst [vmem:[%s3171_s22 + $0x1cc] sm:$0x1] %v2199_v53  ;;  %2027 = vst [vmem:[%s3171_s22 + $0x1d4] sm:$0x1] %v2199_v53 }
 0x14d   : > { %2029 = vst [vmem:[%s3171_s22 + $0x1dc] sm:$0x1] %v2199_v53  ;;  %4050 = vst [vmem:[#allocation27_spill] sm:$0xff] %v3251_v4  ;;  %v3294_v53 = vadd.f32 %v2912_v14, %v3013_v42  ;;  %v647_v4 = vpop.f32.mrb[42].mxu0  ;;  %v3310_v14 = vpop.f32.mrb[42].mxu1 }
 0x14e   : > { %4051 = vst [vmem:[#allocation28_spill] sm:$0xff] %v3255_v60  ;;  %1931 = vst [vmem:[%s3171_s22 + $0x54] sm:$0x1] %v3187_v20  ;;  %v3313_v60 = vadd.f32 %v3018_v43, %v1211_v62  ;;  %v3322_v18 = vpop.f32.mrb[43].mxu0  ;;  %v858_v56 = vpop.f32.mrb[43].mxu1  ;;  %v624_v62 = vadd.f32 %v3067_v24, %v2970_v40  ;;  %v3348_v24 = vadd.f32 %v2963_v25, %v3013_v42 }
 0x14f   : > { %1949 = vst [vmem:[%s3171_s22 + $0x9c] sm:$0x1] %v3187_v20  ;;  %1951 = vst [vmem:[%s3171_s22 + $0xa4] sm:$0x1] %v3187_v20  ;;  %v859_v22 = vadd.f32 %v858_v56, %v2908_v12  ;;  %v653_v35 = vpop.f32.mrb[44].mxu0  ;;  %v3353_v19 = vpop.f32.mrb[44].mxu1  ;;  %v636_v25 = vadd.f32 %v3151_v59, %v2970_v40  ;;  %v1219_v59 = vmul.f32 %v2990_v32, %v630_v30 }
 0x150   : > { %1969 = vst [vmem:[%s3171_s22 + $0xec] sm:$0x1] %v3187_v20  ;;  %1971 = vst [vmem:[%s3171_s22 + $0xf4] sm:$0x1] %v3187_v20  ;;  %v655_v33 = vpop.f32.mrb[45].mxu0  ;;  %v620_v30 = vadd.f32 %v3039_v50, %v2905_v11 }
 0x151   : > { %1989 = vst [vmem:[%s3171_s22 + $0x13c] sm:$0x1] %v3187_v20  ;;  %1991 = vst [vmem:[%s3171_s22 + $0x144] sm:$0x1] %v3187_v20  ;;  %v3351_v56 = vmul.f32 %v859_v22, %v602_v10  ;;  %v3366_v22 = vadd.f32 %v3018_v43, %v1215_v49  ;;  %v608_v10 = vadd.f32 %v4058_v55, %v2905_v11 }
 0x152   : > { %2009 = vst [vmem:[%s3171_s22 + $0x18c] sm:$0x1] %v3187_v20  ;;  %v3303_v20 = vadd.f32 %v3018_v43, %v1210_v34  ;;  %4052 = vst [vmem:[#allocation29_spill] sm:$0xff] %v3308_v1  ;;  %v618_v34 = vadd.f32 %v3026_v23, %v2970_v40  ;;  %v3339_v23 = vadd.f32 %v2952_v48, %v3013_v42 }
 0x153   : > { %4053 = vst [vmem:[#allocation30_spill] sm:$0xff] %v3313_v60  ;;  %4054 = vst [vmem:[#allocation31_spill] sm:$0xff] %v3344_v52  ;;  %v3356_v48 = vadd.f32 %v3018_v43, %v1214_v36  ;;  %v864_v52 = vpop.f32.mrb[45].mxu1  ;;  %v1218_v36 = vmul.f32 %v2990_v32, %v624_v62  ;;  %v3374_v60 = vadd.f32 %v4059_v16, %v3013_v42  ;;  %v659_v16 = vpop.f32.mrb[46].mxu0 }
 0x154   : > { %4055 = vst [vmem:[#allocation32_spill] sm:$0xff] %v3351_v56  ;;  %v1217_v44 = vmul.f32 %v2990_v32, %v618_v34  ;;  %4057 = vst [vmem:[#allocation34_spill] sm:$0xff] %v3366_v22  ;;  %v4060_v34 = vld [vmem:[#allocation11_spill] sm:$0xff]  ;;  %v642_v49 = vadd.f32 %v3217_v57, %v2970_v40  ;;  %v3382_v22 = vadd.f32 %v3018_v43, %v1216_v5  ;;  %v868_v56 = vpop.f32.mrb[46].mxu1 }
 0x155   : > { %4056 = vst [vmem:[#allocation33_spill] sm:$0xff] %v3356_v48  ;;  %v865_v48 = vadd.f32 %v864_v52, %v2908_v12  ;;  %v614_v1 = vadd.f32 %v4060_v34, %v2905_v11  ;;  %v3386_v62 = vadd.f32 %v3028_v58, %v3013_v42  ;;  %v648_v52 = vadd.f32 %v647_v4, %v2970_v40  ;;  %v661_v58 = vpop.f32.mrb[47].mxu0 }
 0x156   : > { %4061 = vst [vmem:[#allocation8_spill] sm:$0xff] %v3382_v22  ;;  %v3392_v34 = vadd.f32 %v3018_v43, %v1217_v44  ;;  %v3398_v57 = vadd.f32 %v3069_v61, %v3013_v42  ;;  %v1220_v5 = vmul.f32 %v2990_v32, %v636_v25  ;;  %v870_v22 = vpop.f32.mrb[47].mxu1  ;;  %v3402_v4 = vadd.f32 %v3018_v43, %v1218_v36 }
 0x157   : > { %v3389_v55 = vmul.f32 %v865_v48, %v608_v10  ;;  %v626_v48 = vadd.f32 %v3079_v54, %v2905_v11  ;;  %v654_v44 = vadd.f32 %v653_v35, %v2970_v40  ;;  %v871_v10 = vadd.f32 %v870_v22, %v2908_v12 }
 0x158   : > { %4062 = vst [vmem:[#allocation10_spill] sm:$0xff] %v3392_v34  ;;  %4063 = vst [vmem:[#allocation11_spill] sm:$0xff] %v3402_v4  ;;  %v3409_v50 = vadd.f32 %v3018_v43, %v1219_v59  ;;  %v3413_v61 = vadd.f32 %v3111_v41, %v3013_v42  ;;  %v3417_v25 = vadd.f32 %v3125_v15, %v2905_v11  ;;  %v2370_v34 = vpop.f32.mrb[48].mxu0 }
 0x159   : > { %v1221_v36 = vmul.f32 %v2990_v32, %v642_v49  ;;  %v3422_v54 = vadd.f32 %v3153_v29, %v3013_v42  ;;  %v1222_v35 = vmul.f32 %v2990_v32, %v648_v52  ;;  %v660_v22 = vadd.f32 %v659_v16, %v2970_v40  ;;  %v1035_v4 = vpop.f32.mrb[49].mxu0 }
 0x15a   : > { %4064 = vst [vmem:[#allocation35_spill] sm:$0xff] %v3409_v50  ;;  %v3426_v59 = vmul.f32 %v871_v10, %v614_v1  ;;  %v874_v50 = vpop.f32.mrb[48].mxu1  ;;  %v3429_v41 = vadd.f32 %v3018_v43, %v1220_v5  ;;  %v3433_v15 = vadd.f32 %v3166_v13, %v2905_v11  ;;  %v3437_v49 = vadd.f32 %v3219_v7, %v3013_v42 }
 0x15b   : > { %v1041_v29 = vadd.f32 %v2370_v34, %v3031_v46  ;;  %v876_v52 = vpop.f32.mrb[49].mxu1  ;;  %v3442_v40 = vadd.f32 %v3261_v45, %v2905_v11  ;;  %v1223_v1 = vmul.f32 %v2990_v32, %v654_v44  ;;  %v1036_v5 = vadd.f32 %v1035_v4, %v3031_v46  ;;  %v3466_v4 = vld [vmem:[%s4022_s5] ss:$0 sm:$0xff] }
 0x15c   : > { %4065 = vst [vmem:[#allocation36_spill] sm:$0xff] %v3429_v41  ;;  %v877_v16 = vadd.f32 %v876_v52, %v2908_v12  ;;  %v3448_v13 = vadd.f32 %v3018_v43, %v1221_v36  ;;  %v3452_v7 = vadd.f32 %v3310_v14, %v3013_v42  ;;  %v3456_v34 = vadd.f32 %v3322_v18, %v2905_v11  ;;  %v880_v52 = vpop.f32.mrb[50].mxu1  ;;  %v2373_v18 = vpop.f32.mrb[50].mxu0 }
 0x15d   : > { %v1275_v45 = vmul.f32 %v1041_v29, %v3298_v47  ;;  %v3460_v10 = vadd.f32 %v3018_v43, %v1222_v35  ;;  %v1224_v44 = vmul.f32 %v2990_v32, %v660_v22  ;;  %v1273_v14 = vmul.f32 %v1036_v5, %v3294_v53  ;;  %v4068_v32 = vld [vmem:[#allocation3_spill] sm:$0xff]  ;;  %v3486_v53 = vld [vmem:[%s4023_s6] ss:$0 sm:$0xff] }
 0x15e   : > { %4066 = vst [vmem:[#allocation37_spill] sm:$0xff] %v3448_v13  ;;  %v3468_v36 = vmul.f32 %v877_v16, %v620_v30  ;;  %v3473_v47 = vadd.f32 %v3353_v19, %v3013_v42  ;;  %v3476_v35 = vadd.f32 %v655_v33, %v2905_v11  ;;  %v1051_v29 = vadd.f32 %v2373_v18, %v3031_v46  ;;  %v882_v13 = vpop.f32.mrb[51].mxu1  ;;  %v4070_v16 = vld [vmem:[#allocation2_spill] sm:$0xff] }
 0x15f   : > { %4067 = vst [vmem:[#allocation38_spill] sm:$0xff] %v3460_v10  ;;  %v1337_v22 = vadd.f32 %v1275_v45, %v4068_v32  ;;  %v1045_v10 = vpop.f32.mrb[51].mxu0  ;;  %v3481_v30 = vadd.f32 %v3018_v43, %v1223_v1  ;;  %v1336_v19 = vadd.f32 %v1273_v14, %v4070_v16  ;;  %v883_v5 = vadd.f32 %v882_v13, %v2908_v12 }
 0x160   : > { %v1046_v33 = vadd.f32 %v1045_v10, %v3031_v46  ;;  %v3492_v45 = vadd.f32 %v868_v56, %v3013_v42  ;;  %v3495_v18 = vadd.f32 %v661_v58, %v2905_v11  ;;  %v1279_v32 = vmul.f32 %v1051_v29, %v3335_v17  ;;  %v886_v10 = vpop.f32.mrb[52].mxu1  ;;  %v2376_v16 = vpop.f32.mrb[52].mxu0  ;;  %v4072_v58 = vld [vmem:[#allocation5_spill] sm:$0xff] }
 0x161   : > { %4069 = vst [vmem:[#allocation3_spill] sm:$0xff] %v3481_v30  ;;  %v1376_v1 = vmul.f32 %v3466_v4, %v1337_v22  ;;  %v3500_v30 = vadd.f32 %v3018_v43, %v1224_v44  ;;  %v1375_v41 = vmul.f32 %v3466_v4, %v1336_v19  ;;  %v3503_v14 = vmul.f32 %v883_v5, %v626_v48  ;;  %v888_v29 = vpop.f32.mrb[53].mxu1  ;;  %v1055_v43 = vpop.f32.mrb[53].mxu0  ;;  %v4073_v19 = vld [vmem:[#allocation4_spill] sm:$0xff] }
 0x162   : > { %v1277_v13 = vmul.f32 %v1046_v33, %v3317_v21  ;;  %v3507_v56 = vadd.f32 %v874_v50, %v3013_v42  ;;  %v1339_v22 = vadd.f32 %v1279_v32, %v4072_v58  ;;  %v1061_v17 = vadd.f32 %v2376_v16, %v3031_v46 }
 0x163   : > { %4071 = vst [vmem:[#allocation2_spill] sm:$0xff] %v3500_v30  ;;  %v1415_v11 = vadd.f32 %v3486_v53, %v1376_v1  ;;  %v1414_v44 = vadd.f32 %v3486_v53, %v1375_v41  ;;  %v889_v5 = vadd.f32 %v888_v29, %v2908_v12  ;;  %v1056_v21 = vadd.f32 %v1055_v43, %v3031_v46  ;;  %v892_v29 = vpop.f32.mrb[54].mxu1  ;;  %v2379_v43 = vpop.f32.mrb[54].mxu0 }
 0x164   : > { %v1338_v48 = vadd.f32 %v1277_v13, %v4073_v19  ;;  %v3518_v50 = vadd.f32 %v880_v52, %v3013_v42  ;;  %v1378_v1 = vmul.f32 %v3466_v4, %v1339_v22  ;;  %v1283_v32 = vmul.f32 %v1061_v17, %v3348_v24  ;;  %v894_v24 = vpop.f32.mrb[55].mxu1  ;;  %v1065_v17 = vpop.f32.mrb[55].mxu0 }
 0x165   : > { %v1447_v33 = vadd.f32 %v1415_v11, %v3072_v37  ;;  %v1446_v16 = vadd.f32 %v1414_v44, %v3051_v51  ;;  %v3525_v41 = vmul.f32 %v889_v5, %v3417_v25  ;;  %v1281_v13 = vmul.f32 %v1056_v21, %v3339_v23  ;;  %v4075_v11 = vld [vmem:[#allocation7_spill] sm:$0xff] }
 0x166   : > { %v1377_v58 = vmul.f32 %v3466_v4, %v1338_v48  ;;  %v1417_v37 = vadd.f32 %v3486_v53, %v1378_v1  ;;  %v3530_v52 = vadd.f32 %v886_v10, %v3013_v42  ;;  %v1341_v22 = vadd.f32 %v1283_v32, %v4075_v11  ;;  %v4076_v48 = vld [vmem:[#allocation6_spill] sm:$0xff] }
 0x167   : > { %4074 = vst [vmem:[#allocation5_spill] sm:$0xff] %v3525_v41  ;;  %v1511_v19 = vrot.slane %v1447_v33, 7  ;;  %v1510_v51 = vrot.slane %v1446_v16, 7  ;;  %v1340_v25 = vadd.f32 %v1281_v13, %v4076_v48  ;;  %v1071_v5 = vadd.f32 %v2379_v43, %v3031_v46  ;;  %v3542_v13 = vpop.f32.mrb[56].mxu1  ;;  %v2382_v43 = vpop.f32.mrb[56].mxu0 }
 0x168   : > { %v1416_v44 = vadd.f32 %v3486_v53, %v1377_v58  ;;  %v1449_v10 = vadd.f32 %v1417_v37, %v3101_v6  ;;  %v1380_v33 = vmul.f32 %v3466_v4, %v1341_v22  ;;  %v900_v41 = vpop.f32.mrb[57].mxu1  ;;  %v1075_v6 = vpop.f32.mrb[57].mxu0 }
 0x169   : > { %v1576_v23 = vsel %vm1574_vm2, 0.0, %v1511_v19  ;;  %v1608_v21 = vsel %vm1574_vm2, %v1511_v19, 0.0  ;;  %v1575_v16 = vsel %vm1574_vm2, 0.0, %v1510_v51  ;;  %v1607_v58 = vsel %vm1574_vm2, %v1510_v51, 0.0 }
 0x16a   : > { %v2271_v1 = vpack.c.bf16 %v1576_v23, %v1576_v23  ;;  %v2272_v32 = vpack.c.bf16 %v1608_v21, %v1608_v21  ;;  %v2269_v11 = vpack.c.bf16 %v1575_v16, %v1575_v16  ;;  %v2270_v48 = vpack.c.bf16 %v1607_v58, %v1607_v58  ;;  %v4077_v58 = vld [vmem:[#allocation12_spill] sm:$0xff] }
 0x16b   : > { %v1513_v30 = vrot.slane %v1449_v10, 7  ;;  %v1448_v19 = vadd.f32 %v1416_v44, %v3090_v2  ;;  %v1419_v37 = vadd.f32 %v3486_v53, %v1380_v33  ;;  %v1379_v22 = vmul.f32 %v3466_v4, %v1340_v25 }
 0x16c   : > { %1934 = vst [vmem:[%s3171_s22 + $0x60] sm:$0xf] %v2271_v1  ;;  %1935 = vst [vmem:[%s3171_s22 + $0x64] sm:$0x1] %v2272_v32  ;;  %v1287_v23 = vmul.f32 %v1071_v5, %v3374_v60  ;;  %v895_v51 = vadd.f32 %v894_v24, %v2908_v12  ;;  %v1066_v44 = vadd.f32 %v1065_v17, %v3031_v46  ;;  %v904_v60 = vpop.f32.mrb[58].mxu1  ;;  %v2385_v5 = vpop.f32.mrb[58].mxu0 }
 0x16d   : > { %1932 = vst [vmem:[%s3171_s22 + $0x58] sm:$0xf] %v2269_v11  ;;  %1933 = vst [vmem:[%s3171_s22 + $0x5c] sm:$0x1] %v2270_v48  ;;  %v1578_v21 = vsel %vm1574_vm2, 0.0, %v1513_v30  ;;  %v1610_v10 = vsel %vm1574_vm2, %v1513_v30, 0.0  ;;  %v1451_v33 = vadd.f32 %v1419_v37, %v3139_v63  ;;  %v1418_v25 = vadd.f32 %v3486_v53, %v1379_v22 }
 0x16e   : > { %v1512_v2 = vrot.slane %v1448_v19, 7  ;;  %v2275_v1 = vpack.c.bf16 %v1578_v21, %v1578_v21  ;;  %v2276_v32 = vpack.c.bf16 %v1610_v10, %v1610_v10  ;;  %v1343_v30 = vadd.f32 %v1287_v23, %v4077_v58  ;;  %v906_v17 = vpop.f32.mrb[59].mxu1  ;;  %v1085_v48 = vpop.f32.mrb[59].mxu0 }
 0x16f   : > { %v3562_v11 = vmul.f32 %v895_v51, %v3433_v15  ;;  %v1515_v37 = vrot.slane %v1451_v33, 7  ;;  %v1450_v22 = vadd.f32 %v1418_v25, %v3117_v0  ;;  %v3568_v21 = vadd.f32 %v892_v29, %v3013_v42  ;;  %v2388_v29 = vpop.f32.mrb[60].mxu0 }
 0x170   : > { %v1577_v24 = vsel %vm1574_vm2, 0.0, %v1512_v2  ;;  %v1609_v16 = vsel %vm1574_vm2, %v1512_v2, 0.0  ;;  %1938 = vst [vmem:[%s3171_s22 + $0x70] sm:$0xf] %v2275_v1  ;;  %1939 = vst [vmem:[%s3171_s22 + $0x74] sm:$0x1] %v2276_v32  ;;  %v1382_v10 = vmul.f32 %v3466_v4, %v1343_v30  ;;  %v1285_v2 = vmul.f32 %v1066_v44, %v3360_v9 }
 0x171   : > { %v2273_v63 = vpack.c.bf16 %v1577_v24, %v1577_v24  ;;  %v2274_v19 = vpack.c.bf16 %v1609_v16, %v1609_v16  ;;  %v1081_v23 = vadd.f32 %v2382_v43, %v3031_v46  ;;  %v1580_v15 = vsel %vm1574_vm2, 0.0, %v1515_v37  ;;  %v3578_v32 = vpop.f32.mrb[60].mxu1  ;;  %v4078_v44 = vld [vmem:[#allocation9_spill] sm:$0xff]  ;;  %v1095_v16 = vpop.f32.mrb[61].mxu0 }
 0x172   : > { %v1612_v51 = vsel %vm1574_vm2, %v1515_v37, 0.0  ;;  %v1514_v1 = vrot.slane %v1450_v22, 7  ;;  %v901_v0 = vadd.f32 %v900_v41, %v2908_v12  ;;  %v2279_v33 = vpack.c.bf16 %v1580_v15, %v1580_v15  ;;  %v912_v24 = vpop.f32.mrb[61].mxu1 }
 0x173   : > { %1936 = vst [vmem:[%s3171_s22 + $0x68] sm:$0xf] %v2273_v63  ;;  %1937 = vst [vmem:[%s3171_s22 + $0x6c] sm:$0x1] %v2274_v19  ;;  %v2280_v25 = vpack.c.bf16 %v1612_v51, %v1612_v51  ;;  %v1421_v9 = vadd.f32 %v3486_v53, %v1382_v10  ;;  %v1342_v43 = vadd.f32 %v1285_v2, %v4078_v44 }
 0x174   : > { %v1579_v58 = vsel %vm1574_vm2, 0.0, %v1514_v1  ;;  %v1611_v30 = vsel %vm1574_vm2, %v1514_v1, 0.0  ;;  %v1291_v63 = vmul.f32 %v1081_v23, %v3398_v57  ;;  %v3586_v41 = vmul.f32 %v901_v0, %v3442_v40  ;;  %1942 = vst [vmem:[%s3171_s22 + $0x80] sm:$0xf] %v2279_v33  ;;  %v3599_v40 = vpop.f32.mrb[62].mxu1  ;;  %v3601_v23 = vpop.f32.mrb[62].mxu0 }
 0x175   : > { %1943 = vst [vmem:[%s3171_s22 + $0x84] sm:$0x1] %v2280_v25  ;;  %v2277_v19 = vpack.c.bf16 %v1579_v58, %v1579_v58  ;;  %v2278_v37 = vpack.c.bf16 %v1611_v30, %v1611_v30  ;;  %v1453_v22 = vadd.f32 %v1421_v9, %v3281_v8  ;;  %v1381_v10 = vmul.f32 %v3466_v4, %v1342_v43  ;;  %v3608_v33 = vpop.f32.mrb[63].mxu1 }
 0x176   : > { %v3594_v2 = vadd.f32 %v3542_v13, %v3013_v42  ;;  %v1345_v15 = vadd.f32 %v1291_v63, %v3107_v39  ;;  %v1076_v51 = vadd.f32 %v1075_v6, %v3031_v46  ;;  %v1091_v57 = vadd.f32 %v2385_v5, %v3031_v46  ;;  %v3610_v39 = vpop.f32.mrb[63].mxu0  ;;  %v3626_v63 = vpop.f32.mrb[64].mxu1 }
 0x177   : > { %1940 = vst [vmem:[%s3171_s22 + $0x78] sm:$0xf] %v2277_v19  ;;  %1941 = vst [vmem:[%s3171_s22 + $0x7c] sm:$0x1] %v2278_v37  ;;  %v1517_v1 = vrot.slane %v1453_v22, 7  ;;  %v1420_v8 = vadd.f32 %v3486_v53, %v1381_v10  ;;  %v907_v0 = vadd.f32 %v906_v17, %v2908_v12  ;;  %v1086_v13 = vadd.f32 %v1085_v48, %v3031_v46  ;;  %v3633_v10 = vpop.f32.mrb[65].mxu1 }
 0x178   : > { %v1384_v6 = vmul.f32 %v3466_v4, %v1345_v15  ;;  %v1289_v5 = vmul.f32 %v1076_v51, %v3386_v62  ;;  %v3615_v25 = vadd.f32 %v904_v60, %v3013_v42  ;;  %v1295_v9 = vmul.f32 %v1091_v57, %v3422_v54  ;;  %v3628_v54 = vpop.f32.mrb[64].mxu0 }
 0x179   : > { %v1582_v44 = vsel %vm1574_vm2, 0.0, %v1517_v1  ;;  %v1614_v17 = vsel %vm1574_vm2, %v1517_v1, 0.0  ;;  %v1452_v48 = vadd.f32 %v1420_v8, %v3210_v3  ;;  %v3622_v43 = vmul.f32 %v907_v0, %v3456_v34  ;;  %v3635_v34 = vpop.f32.mrb[65].mxu0 }
 0x17a   : > { %v2283_v58 = vpack.c.bf16 %v1582_v44, %v1582_v44  ;;  %v2284_v30 = vpack.c.bf16 %v1614_v17, %v1614_v17  ;;  %v1423_v62 = vadd.f32 %v3486_v53, %v1384_v6  ;;  %v1344_v60 = vadd.f32 %v1289_v5, %v3065_v26  ;;  %v3648_v6 = vpop.f32.mrb[66].mxu1 }
 0x17b   : > { %v1516_v19 = vrot.slane %v1452_v48, 7  ;;  %v1347_v37 = vadd.f32 %v1295_v9, %v3215_v31  ;;  %v1293_v22 = vmul.f32 %v1086_v13, %v3413_v61  ;;  %v1101_v3 = vadd.f32 %v2388_v29, %v3031_v46  ;;  %v3658_v17 = vpop.f32.mrb[67].mxu1 }
 0x17c   : > { %1946 = vst [vmem:[%s3171_s22 + $0x90] sm:$0xf] %v2283_v58  ;;  %1947 = vst [vmem:[%s3171_s22 + $0x94] sm:$0x1] %v2284_v30  ;;  %v1455_v15 = vadd.f32 %v1423_v62, %v3303_v20  ;;  %v1383_v26 = vmul.f32 %v3466_v4, %v1344_v60  ;;  %v913_v51 = vadd.f32 %v912_v24, %v2908_v12  ;;  %v3650_v24 = vpop.f32.mrb[66].mxu0 }
 0x17d   : > { %v1096_v57 = vadd.f32 %v1095_v16, %v3031_v46  ;;  %v1581_v31 = vsel %vm1574_vm2, 0.0, %v1516_v19  ;;  %v1613_v61 = vsel %vm1574_vm2, %v1516_v19, 0.0  ;;  %v1386_v29 = vmul.f32 %v3466_v4, %v1347_v37 }
 0x17e   : > { %v1346_v1 = vadd.f32 %v1293_v22, %v3149_v38  ;;  %v2281_v8 = vpack.c.bf16 %v1581_v31, %v1581_v31  ;;  %v2282_v0 = vpack.c.bf16 %v1613_v61, %v1613_v61  ;;  %v1519_v13 = vrot.slane %v1455_v15, 7  ;;  %v3660_v38 = vpop.f32.mrb[67].mxu0  ;;  %v3676_v31 = vpop.f32.mrb[68].mxu1 }
 0x17f   : > { %v1422_v20 = vadd.f32 %v3486_v53, %v1383_v26  ;;  %v1425_v16 = vadd.f32 %v3486_v53, %v1386_v29  ;;  %v1299_v9 = vmul.f32 %v1101_v3, %v3452_v7  ;;  %v3656_v44 = vmul.f32 %v913_v51, %v3476_v35  ;;  %v4079_v3 = vld [vmem:[#allocation32_spill] sm:$0xff]  ;;  %v4080_v26 = vld [vmem:[#allocation29_spill] sm:$0xff]  ;;  %v3687_v29 = vpop.f32.mrb[69].mxu1 }
 0x180   : > { %v1385_v5 = vmul.f32 %v3466_v4, %v1346_v1  ;;  %1944 = vst [vmem:[%s3171_s22 + $0x88] sm:$0xf] %v2281_v8  ;;  %1945 = vst [vmem:[%s3171_s22 + $0x8c] sm:$0x1] %v2282_v0  ;;  %v1584_v48 = vsel %vm1574_vm2, 0.0, %v1519_v13  ;;  %v1616_v58 = vsel %vm1574_vm2, %v1519_v13, 0.0  ;;  %v1297_v62 = vmul.f32 %v1096_v57, %v3437_v49 }
 0x181   : > { %v1454_v30 = vadd.f32 %v1422_v20, %v3290_v27  ;;  %v2287_v7 = vpack.c.bf16 %v1584_v48, %v1584_v48  ;;  %v2288_v60 = vpack.c.bf16 %v1616_v58, %v1616_v58  ;;  %v1457_v35 = vadd.f32 %v1425_v16, %v3331_v28  ;;  %v3678_v27 = vpop.f32.mrb[68].mxu0  ;;  %v4081_v57 = vld [vmem:[#allocation30_spill] sm:$0xff] }
 0x182   : > { %v1424_v19 = vadd.f32 %v3486_v53, %v1385_v5  ;;  %v3672_v22 = vadd.f32 %v3578_v32, %v3013_v42  ;;  %v1349_v15 = vadd.f32 %v1299_v9, %v4079_v3  ;;  %v1348_v51 = vadd.f32 %v1297_v62, %v4080_v26  ;;  %v3689_v1 = vpop.f32.mrb[69].mxu0  ;;  %v3698_v62 = vpop.f32.mrb[70].mxu1 }
 0x183   : > { %v1518_v37 = vrot.slane %v1454_v30, 7  ;;  %1954 = vst [vmem:[%s3171_s22 + $0xb0] sm:$0xf] %v2287_v7  ;;  %1955 = vst [vmem:[%s3171_s22 + $0xb4] sm:$0x1] %v2288_v60  ;;  %v1521_v49 = vrot.slane %v1457_v35, 7  ;;  %v1111_v61 = vadd.f32 %v3601_v23, %v3031_v46  ;;  %v919_v32 = vadd.f32 %v3608_v33, %v2908_v12 }
 0x184   : > { %v1456_v28 = vadd.f32 %v1424_v19, %v4081_v57  ;;  %v1388_v13 = vmul.f32 %v3466_v4, %v1349_v15  ;;  %v1387_v20 = vmul.f32 %v3466_v4, %v1348_v51  ;;  %v3700_v7 = vpop.f32.mrb[70].mxu0  ;;  %v3711_v3 = vpop.f32.mrb[71].mxu1 }
 0x185   : > { %v1583_v8 = vsel %vm1574_vm2, 0.0, %v1518_v37  ;;  %v1615_v0 = vsel %vm1574_vm2, %v1518_v37, 0.0  ;;  %v1586_v23 = vsel %vm1574_vm2, 0.0, %v1521_v49  ;;  %v1618_v33 = vsel %vm1574_vm2, %v1521_v49, 0.0  ;;  %v3713_v15 = vpop.f32.mrb[71].mxu0  ;;  %v4082_v49 = vld [vmem:[#allocation33_spill] sm:$0xff] }
 0x186   : > { %v2285_v16 = vpack.c.bf16 %v1583_v8, %v1583_v8  ;;  %v2286_v5 = vpack.c.bf16 %v1615_v0, %v1615_v0  ;;  %v2291_v9 = vpack.c.bf16 %v1586_v23, %v1586_v23  ;;  %v2292_v48 = vpack.c.bf16 %v1618_v33, %v1618_v33 }
 0x187   : > { %v1520_v58 = vrot.slane %v1456_v28, 7  ;;  %v1427_v30 = vadd.f32 %v3486_v53, %v1388_v13  ;;  %v1426_v60 = vadd.f32 %v3486_v53, %v1387_v20  ;;  %v1303_v35 = vmul.f32 %v1111_v61, %v3492_v45  ;;  %v4083_v28 = vld [vmem:[#allocation31_spill] sm:$0xff] }
 0x188   : > { %1952 = vst [vmem:[%s3171_s22 + $0xa8] sm:$0xf] %v2285_v16  ;;  %1953 = vst [vmem:[%s3171_s22 + $0xac] sm:$0x1] %v2286_v5  ;;  %v3707_v19 = vmul.f32 %v919_v32, %v3495_v18  ;;  %v1106_v37 = vadd.f32 %v3610_v39, %v3031_v46  ;;  %v3722_v18 = vadd.f32 %v3599_v40, %v3013_v42  ;;  %v3733_v16 = vpop.f32.mrb[72].mxu1  ;;  %v3735_v40 = vpop.f32.mrb[72].mxu0 }
 0x189   : > { %1958 = vst [vmem:[%s3171_s22 + $0xc0] sm:$0xf] %v2291_v9  ;;  %1959 = vst [vmem:[%s3171_s22 + $0xc4] sm:$0x1] %v2292_v48  ;;  %v1585_v26 = vsel %vm1574_vm2, 0.0, %v1520_v58  ;;  %v1617_v51 = vsel %vm1574_vm2, %v1520_v58, 0.0  ;;  %v1459_v45 = vadd.f32 %v1427_v30, %v4082_v49  ;;  %v1458_v61 = vadd.f32 %v1426_v60, %v4083_v28 }
 0x18a   : > { %v2289_v57 = vpack.c.bf16 %v1585_v26, %v1585_v26  ;;  %v2290_v39 = vpack.c.bf16 %v1617_v51, %v1617_v51  ;;  %v1351_v32 = vadd.f32 %v1303_v35, %v3426_v59  ;;  %v1301_v0 = vmul.f32 %v1106_v37, %v3473_v47  ;;  %v3746_v33 = vpop.f32.mrb[73].mxu0 }
 0x18b   : > { %v1523_v8 = vrot.slane %v1459_v45, 7  ;;  %v3729_v13 = vadd.f32 %v3626_v63, %v3013_v42  ;;  %v1121_v20 = vadd.f32 %v3628_v54, %v3031_v46  ;;  %v1522_v5 = vrot.slane %v1458_v61, 7  ;;  %v3744_v63 = vpop.f32.mrb[73].mxu1  ;;  %v3758_v45 = vpop.f32.mrb[74].mxu0 }
 0x18c   : > { %1956 = vst [vmem:[%s3171_s22 + $0xb8] sm:$0xf] %v2289_v57  ;;  %1957 = vst [vmem:[%s3171_s22 + $0xbc] sm:$0x1] %v2290_v39  ;;  %v1390_v23 = vmul.f32 %v3466_v4, %v1351_v32  ;;  %v925_v59 = vadd.f32 %v3633_v10, %v2908_v12  ;;  %v1116_v47 = vadd.f32 %v3635_v34, %v3031_v46  ;;  %v3756_v49 = vpop.f32.mrb[74].mxu1  ;;  %v3771_v32 = vpop.f32.mrb[75].mxu0 }
 0x18d   : > { %v1588_v54 = vsel %vm1574_vm2, 0.0, %v1523_v8  ;;  %v1620_v9 = vsel %vm1574_vm2, %v1523_v8, 0.0  ;;  %v1350_v48 = vadd.f32 %v1301_v0, %v3389_v55  ;;  %v1307_v58 = vmul.f32 %v1121_v20, %v3518_v50  ;;  %v4084_v50 = vld [vmem:[#allocation13_spill] sm:$0xff]  ;;  %v3769_v61 = vpop.f32.mrb[75].mxu1  ;;  %v4085_v8 = vld [vmem:[#allocation8_spill] sm:$0xff] }
 0x18e   : > { %v2295_v30 = vpack.c.bf16 %v1588_v54, %v1588_v54  ;;  %v2296_v60 = vpack.c.bf16 %v1620_v9, %v1620_v9  ;;  %v1587_v10 = vsel %vm1574_vm2, 0.0, %v1522_v5  ;;  %v1619_v34 = vsel %vm1574_vm2, %v1522_v5, 0.0  ;;  %v4086_v54 = vld [vmem:[#allocation34_spill] sm:$0xff] }
 0x18f   : > { %v2293_v35 = vpack.c.bf16 %v1587_v10, %v1587_v10  ;;  %v2294_v37 = vpack.c.bf16 %v1619_v34, %v1619_v34  ;;  %v1429_v26 = vadd.f32 %v3486_v53, %v1390_v23  ;;  %v1389_v51 = vmul.f32 %v3466_v4, %v1350_v48  ;;  %v4087_v48 = vld [vmem:[#allocation15_spill] sm:$0xff] }
 0x190   : > { %1962 = vst [vmem:[%s3171_s22 + $0xd0] sm:$0xf] %v2295_v30  ;;  %1963 = vst [vmem:[%s3171_s22 + $0xd4] sm:$0x1] %v2296_v60  ;;  %v1353_v55 = vadd.f32 %v1307_v58, %v3503_v14  ;;  %v3764_v57 = vmul.f32 %v925_v59, %v4084_v50  ;;  %v1305_v39 = vmul.f32 %v1116_v47, %v3507_v56  ;;  %v3793_v30 = vpop.f32.mrb[76].mxu1 }
 0x191   : > { %v1131_v28 = vadd.f32 %v3650_v24, %v3031_v46  ;;  %1960 = vst [vmem:[%s3171_s22 + $0xc8] sm:$0xf] %v2293_v35  ;;  %1961 = vst [vmem:[%s3171_s22 + $0xcc] sm:$0x1] %v2294_v37  ;;  %v1461_v0 = vadd.f32 %v1429_v26, %v4085_v8  ;;  %v1428_v20 = vadd.f32 %v3486_v53, %v1389_v51  ;;  %v3802_v10 = vpop.f32.mrb[77].mxu1  ;;  %v4088_v26 = vld [vmem:[#allocation5_spill] sm:$0xff] }
 0x192   : > { %v931_v14 = vadd.f32 %v3658_v17, %v2908_v12  ;;  %v1126_v5 = vadd.f32 %v3660_v38, %v3031_v46  ;;  %v1392_v56 = vmul.f32 %v3466_v4, %v1353_v55  ;;  %v1352_v24 = vadd.f32 %v1305_v39, %v3468_v36  ;;  %v3795_v38 = vpop.f32.mrb[76].mxu0  ;;  %v4089_v39 = vld [vmem:[#allocation11_spill] sm:$0xff] }
 0x193   : > { %v3785_v23 = vadd.f32 %v3648_v6, %v3013_v42  ;;  %v1311_v59 = vmul.f32 %v1131_v28, %v3568_v21  ;;  %v1525_v47 = vrot.slane %v1461_v0, 7  ;;  %v1460_v9 = vadd.f32 %v1428_v20, %v4086_v54  ;;  %v3804_v34 = vpop.f32.mrb[77].mxu0 }
 0x194   : > { %v3790_v58 = vmul.f32 %v931_v14, %v4087_v48  ;;  %v1309_v17 = vmul.f32 %v1126_v5, %v3530_v52  ;;  %v1431_v36 = vadd.f32 %v3486_v53, %v1392_v56  ;;  %v1391_v60 = vmul.f32 %v3466_v4, %v1352_v24  ;;  %v3815_v14 = vpop.f32.mrb[78].mxu1  ;;  %v3817_v5 = vpop.f32.mrb[78].mxu0 }
 0x195   : > { %v1355_v6 = vadd.f32 %v1311_v59, %v3562_v11  ;;  %v1141_v21 = vadd.f32 %v3678_v27, %v3031_v46  ;;  %v1590_v52 = vsel %vm1574_vm2, 0.0, %v1525_v47  ;;  %v1622_v35 = vsel %vm1574_vm2, %v1525_v47, 0.0  ;;  %v4090_v47 = vld [vmem:[#allocation10_spill] sm:$0xff]  ;;  %v3824_v48 = vpop.f32.mrb[79].mxu0 }
 0x196   : > { %v1524_v37 = vrot.slane %v1460_v9, 7  ;;  %v1354_v51 = vadd.f32 %v1309_v17, %v4088_v26  ;;  %v2299_v55 = vpack.c.bf16 %v1590_v52, %v1590_v52  ;;  %v2300_v50 = vpack.c.bf16 %v1622_v35, %v1622_v35  ;;  %v3822_v9 = vpop.f32.mrb[79].mxu1 }
 0x197   : > { %v1463_v11 = vadd.f32 %v1431_v36, %v4089_v39  ;;  %v1430_v28 = vadd.f32 %v3486_v53, %v1391_v60  ;;  %v1394_v0 = vmul.f32 %v3466_v4, %v1355_v6  ;;  %v1315_v60 = vmul.f32 %v1141_v21, %v3615_v25  ;;  %v4092_v25 = vld [vmem:[#allocation35_spill] sm:$0xff] }
 0x198   : > { %v1589_v27 = vsel %vm1574_vm2, 0.0, %v1524_v37  ;;  %v1621_v8 = vsel %vm1574_vm2, %v1524_v37, 0.0  ;;  %v1393_v20 = vmul.f32 %v3466_v4, %v1354_v51  ;;  %1966 = vst [vmem:[%s3171_s22 + $0xe0] sm:$0xf] %v2299_v55  ;;  %1967 = vst [vmem:[%s3171_s22 + $0xe4] sm:$0x1] %v2300_v50  ;;  %v937_v6 = vadd.f32 %v3687_v29, %v2908_v12 }
 0x199   : > { %v2297_v56 = vpack.c.bf16 %v1589_v27, %v1589_v27  ;;  %v2298_v24 = vpack.c.bf16 %v1621_v8, %v1621_v8  ;;  %v1527_v59 = vrot.slane %v1463_v11, 7  ;;  %v1462_v54 = vadd.f32 %v1430_v28, %v4090_v47  ;;  %v4091_v50 = vld [vmem:[#allocation36_spill] sm:$0xff]  ;;  %v4093_v27 = vld [vmem:[#allocation17_spill] sm:$0xff] }
 0x19a   : > { %v1433_v17 = vadd.f32 %v3486_v53, %v1394_v0  ;;  %v1432_v36 = vadd.f32 %v3486_v53, %v1393_v20  ;;  %v1136_v26 = vadd.f32 %v3689_v1, %v3031_v46  ;;  %v1357_v28 = vadd.f32 %v1315_v60, %v3622_v43 }
 0x19b   : > { %1964 = vst [vmem:[%s3171_s22 + $0xd8] sm:$0xf] %v2297_v56  ;;  %1965 = vst [vmem:[%s3171_s22 + $0xdc] sm:$0x1] %v2298_v24  ;;  %v1592_v52 = vsel %vm1574_vm2, 0.0, %v1527_v59  ;;  %v1624_v35 = vsel %vm1574_vm2, %v1527_v59, 0.0  ;;  %v3843_v8 = vmul.f32 %v937_v6, %v4093_v27  ;;  %v3849_v24 = vadd.f32 %v3676_v31, %v3013_v42 }
 0x19c   : > { %v1526_v37 = vrot.slane %v1462_v54, 7  ;;  %v2303_v51 = vpack.c.bf16 %v1592_v52, %v1592_v52  ;;  %v2304_v55 = vpack.c.bf16 %v1624_v35, %v1624_v35  ;;  %v1465_v39 = vadd.f32 %v1433_v17, %v4091_v50 }
 0x19d   : > { %v1464_v21 = vadd.f32 %v1432_v36, %v4092_v25  ;;  %v1396_v59 = vmul.f32 %v3466_v4, %v1357_v28  ;;  %v1313_v47 = vmul.f32 %v1136_v26, %v3594_v2  ;;  %v1151_v43 = vadd.f32 %v3700_v7, %v3031_v46  ;;  %v4096_v28 = vld [vmem:[#allocation21_spill] sm:$0xff] }
 0x19e   : > { %v1591_v29 = vsel %vm1574_vm2, 0.0, %v1526_v37  ;;  %v1623_v11 = vsel %vm1574_vm2, %v1526_v37, 0.0  ;;  %1974 = vst [vmem:[%s3171_s22 + $0x100] sm:$0xf] %v2303_v51  ;;  %1975 = vst [vmem:[%s3171_s22 + $0x104] sm:$0x1] %v2304_v55  ;;  %v943_v26 = vadd.f32 %v3711_v3, %v2908_v12  ;;  %v941_v51 = vadd.f32 %v3698_v62, %v3013_v42 }
 0x19f   : > { %v2301_v1 = vpack.c.bf16 %v1591_v29, %v1591_v29  ;;  %v2302_v0 = vpack.c.bf16 %v1623_v11, %v1623_v11  ;;  %v1529_v20 = vrot.slane %v1465_v39, 7  ;;  %v1528_v56 = vrot.slane %v1464_v21, 7  ;;  %v4095_v21 = vld [vmem:[#allocation19_spill] sm:$0xff] }
 0x1a0   : > { %v1435_v35 = vadd.f32 %v3486_v53, %v1396_v59  ;;  %v1356_v7 = vadd.f32 %v1313_v47, %v3586_v41  ;;  %v1319_v37 = vmul.f32 %v1151_v43, %v3722_v18  ;;  %v1146_v55 = vadd.f32 %v3713_v15, %v3031_v46  ;;  %v4094_v18 = vld [vmem:[#allocation38_spill] sm:$0xff]  ;;  %v4097_v59 = vld [vmem:[#allocation37_spill] sm:$0xff] }
 0x1a1   : > { %1972 = vst [vmem:[%s3171_s22 + $0xf8] sm:$0xf] %v2301_v1  ;;  %1973 = vst [vmem:[%s3171_s22 + $0xfc] sm:$0x1] %v2302_v0  ;;  %v1594_v54 = vsel %vm1574_vm2, 0.0, %v1529_v20  ;;  %v1626_v17 = vsel %vm1574_vm2, %v1529_v20, 0.0  ;;  %v1161_v50 = vadd.f32 %v3735_v40, %v3031_v46  ;;  %v949_v41 = vadd.f32 %v3744_v63, %v2908_v12 }
 0x1a2   : > { %v1593_v31 = vsel %vm1574_vm2, 0.0, %v1528_v56  ;;  %v1625_v36 = vsel %vm1574_vm2, %v1528_v56, 0.0  ;;  %v2307_v60 = vpack.c.bf16 %v1594_v54, %v1594_v54  ;;  %v2308_v6 = vpack.c.bf16 %v1626_v17, %v1626_v17 }
 0x1a3   : > { %v2305_v2 = vpack.c.bf16 %v1593_v31, %v1593_v31  ;;  %v2306_v52 = vpack.c.bf16 %v1625_v36, %v1625_v36  ;;  %v1467_v39 = vadd.f32 %v1435_v35, %v4094_v18  ;;  %v1395_v3 = vmul.f32 %v3466_v4, %v1356_v7  ;;  %v4098_v31 = vld [vmem:[#allocation2_spill] sm:$0xff] }
 0x1a4   : > { %1978 = vst [vmem:[%s3171_s22 + $0x110] sm:$0xf] %v2307_v60  ;;  %1979 = vst [vmem:[%s3171_s22 + $0x114] sm:$0x1] %v2308_v6  ;;  %v1359_v25 = vadd.f32 %v1319_v37, %v3707_v19  ;;  %v1326_v29 = vmul.f32 %v943_v26, %v4095_v21  ;;  %v1317_v11 = vmul.f32 %v1146_v55, %v3672_v22  ;;  %v4099_v55 = vld [vmem:[#allocation3_spill] sm:$0xff] }
 0x1a5   : > { %1976 = vst [vmem:[%s3171_s22 + $0x108] sm:$0xf] %v2305_v2  ;;  %1977 = vst [vmem:[%s3171_s22 + $0x10c] sm:$0x1] %v2306_v52  ;;  %v1323_v62 = vmul.f32 %v1161_v50, %v3785_v23  ;;  %v3885_v15 = vmul.f32 %v949_v41, %v4096_v28  ;;  %v1156_v40 = vadd.f32 %v3746_v33, %v3031_v46  ;;  %v1531_v27 = vrot.slane %v1467_v39, 7  ;;  %v4100_v41 = vld [vmem:[#allocation16_spill] sm:$0xff] }
 0x1a6   : > { %v1434_v63 = vadd.f32 %v3486_v53, %v1395_v3  ;;  %v1398_v1 = vmul.f32 %v3466_v4, %v1359_v25  ;;  %v3893_v19 = vadd.f32 %v3733_v16, %v3013_v42  ;;  %v1358_v0 = vadd.f32 %v1317_v11, %v3656_v44  ;;  %v4101_v28 = vld [vmem:[#allocation14_spill] sm:$0xff] }
 0x1a7   : > { %v1361_v22 = vadd.f32 %v1323_v62, %v3790_v58  ;;  %v1321_v23 = vmul.f32 %v1156_v40, %v3729_v13  ;;  %v1171_v33 = vadd.f32 %v3758_v45, %v3031_v46  ;;  %v1596_v20 = vsel %vm1574_vm2, 0.0, %v1531_v27 }
 0x1a8   : > { %v1628_v56 = vsel %vm1574_vm2, %v1531_v27, 0.0  ;;  %v1466_v47 = vadd.f32 %v1434_v63, %v4097_v59  ;;  %v1437_v16 = vadd.f32 %v3486_v53, %v1398_v1  ;;  %v2311_v43 = vpack.c.bf16 %v1596_v20, %v1596_v20  ;;  %v4102_v63 = vld [vmem:[#allocation23_spill] sm:$0xff] }
 0x1a9   : > { %v2312_v54 = vpack.c.bf16 %v1628_v56, %v1628_v56  ;;  %v1397_v44 = vmul.f32 %v3466_v4, %v1358_v0  ;;  %v1400_v58 = vmul.f32 %v3466_v4, %v1361_v22  ;;  %v1360_v36 = vadd.f32 %v1321_v23, %v3764_v57 }
 0x1aa   : > { %v1530_v17 = vrot.slane %v1466_v47, 7  ;;  %v1469_v13 = vadd.f32 %v1437_v16, %v4098_v31  ;;  %v1327_v45 = vmul.f32 %v1171_v33, %v941_v51  ;;  %1982 = vst [vmem:[%s3171_s22 + $0x120] sm:$0xf] %v2311_v43  ;;  %v955_v2 = vadd.f32 %v3769_v61, %v2908_v12 }
 0x1ab   : > { %1983 = vst [vmem:[%s3171_s22 + $0x124] sm:$0x1] %v2312_v54  ;;  %v1436_v60 = vadd.f32 %v3486_v53, %v1397_v44  ;;  %v1439_v6 = vadd.f32 %v3486_v53, %v1400_v58  ;;  %v1166_v52 = vadd.f32 %v3771_v32, %v3031_v46  ;;  %v1399_v37 = vmul.f32 %v3466_v4, %v1360_v36 }
 0x1ac   : > { %v1595_v35 = vsel %vm1574_vm2, 0.0, %v1530_v17  ;;  %v1627_v7 = vsel %vm1574_vm2, %v1530_v17, 0.0  ;;  %v1533_v57 = vrot.slane %v1469_v13, 7  ;;  %v1363_v3 = vadd.f32 %v1327_v45, %v1326_v29  ;;  %v4103_v13 = vld [vmem:[#allocation20_spill] sm:$0xff] }
 0x1ad   : > { %v2309_v26 = vpack.c.bf16 %v1595_v35, %v1595_v35  ;;  %v2310_v51 = vpack.c.bf16 %v1627_v7, %v1627_v7  ;;  %v1468_v50 = vadd.f32 %v1436_v60, %v4099_v55  ;;  %v1471_v18 = vadd.f32 %v1439_v6, %v4100_v41 }
 0x1ae   : > { %v1598_v61 = vsel %vm1574_vm2, 0.0, %v1533_v57  ;;  %v1630_v39 = vsel %vm1574_vm2, %v1533_v57, 0.0  ;;  %v1438_v32 = vadd.f32 %v3486_v53, %v1399_v37  ;;  %v1402_v27 = vmul.f32 %v3466_v4, %v1363_v3 }
 0x1af   : > { %1980 = vst [vmem:[%s3171_s22 + $0x118] sm:$0xf] %v2309_v26  ;;  %1981 = vst [vmem:[%s3171_s22 + $0x11c] sm:$0x1] %v2310_v51  ;;  %v2315_v25 = vpack.c.bf16 %v1598_v61, %v1598_v61  ;;  %v2316_v21 = vpack.c.bf16 %v1630_v39, %v1630_v39  ;;  %v1532_v11 = vrot.slane %v1468_v50, 7  ;;  %v1535_v62 = vrot.slane %v1471_v18, 7 }
 0x1b0   : > { %v1470_v40 = vadd.f32 %v1438_v32, %v4101_v28  ;;  %v1330_v1 = vmul.f32 %v955_v2, %v4102_v63  ;;  %v1325_v0 = vmul.f32 %v1166_v52, %v3849_v24  ;;  %v953_v24 = vadd.f32 %v3756_v49, %v3013_v42  ;;  %v4104_v2 = vld [vmem:[#allocation26_spill] sm:$0xff]  ;;  %v4107_v32 = vld [vmem:[#allocation24_spill] sm:$0xff] }
 0x1b1   : > { %1986 = vst [vmem:[%s3171_s22 + $0x130] sm:$0xf] %v2315_v25  ;;  %1987 = vst [vmem:[%s3171_s22 + $0x134] sm:$0x1] %v2316_v21  ;;  %v1597_v29 = vsel %vm1574_vm2, 0.0, %v1532_v11  ;;  %v1629_v22 = vsel %vm1574_vm2, %v1532_v11, 0.0  ;;  %v1441_v43 = vadd.f32 %v3486_v53, %v1402_v27  ;;  %v1181_v44 = vadd.f32 %v3795_v38, %v3031_v46 }
 0x1b2   : > { %v1600_v23 = vsel %vm1574_vm2, 0.0, %v1535_v62  ;;  %v1632_v33 = vsel %vm1574_vm2, %v1535_v62, 0.0  ;;  %v2313_v20 = vpack.c.bf16 %v1597_v29, %v1597_v29  ;;  %v2314_v56 = vpack.c.bf16 %v1629_v22, %v1629_v22  ;;  %v2432_v39 = vld [vmem:[%s4021_s4] ss:$0 sm:$0xff]  ;;  %v4108_v25 = vld [vmem:[#allocation25_spill] sm:$0xff]  ;;  %v4109_v11 = vld [vmem:[#allocation27_spill] sm:$0xff] }
 0x1b3   : > { %v2319_v59 = vpack.c.bf16 %v1600_v23, %v1600_v23  ;;  %v2320_v47 = vpack.c.bf16 %v1632_v33, %v1632_v33  ;;  %v1534_v16 = vrot.slane %v1470_v40, 7  ;;  %v1362_v54 = vadd.f32 %v1325_v0, %v3843_v8  ;;  %v4110_v33 = vld [vmem:[#allocation22_spill] sm:$0xff] }
 0x1b4   : > { %1984 = vst [vmem:[%s3171_s22 + $0x128] sm:$0xf] %v2313_v20  ;;  %1985 = vst [vmem:[%s3171_s22 + $0x12c] sm:$0x1] %v2314_v56  ;;  %v961_v58 = vadd.f32 %v3802_v10, %v2908_v12  ;;  %v1176_v17 = vadd.f32 %v3804_v34, %v3031_v46  ;;  %v965_v49 = vadd.f32 %v3815_v14, %v3013_v42 }
 0x1b5   : > { %1994 = vst [vmem:[%s3171_s22 + $0x150] sm:$0xf] %v2319_v59  ;;  %1995 = vst [vmem:[%s3171_s22 + $0x154] sm:$0x1] %v2320_v47  ;;  %v1599_v8 = vsel %vm1574_vm2, 0.0, %v1534_v16  ;;  %v1631_v31 = vsel %vm1574_vm2, %v1534_v16, 0.0  ;;  %v1473_v36 = vadd.f32 %v1441_v43, %v4103_v13  ;;  %v1401_v45 = vmul.f32 %v3466_v4, %v1362_v54 }
 0x1b6   : > { %v2317_v38 = vpack.c.bf16 %v1599_v8, %v1599_v8  ;;  %v2318_v60 = vpack.c.bf16 %v1631_v31, %v1631_v31  ;;  %v1331_v6 = vmul.f32 %v1181_v44, %v953_v24  ;;  %v1332_v10 = vmul.f32 %v961_v58, %v4104_v2 }
 0x1b7   : > { %v1537_v52 = vrot.slane %v1473_v36, 7  ;;  %v1440_v35 = vadd.f32 %v3486_v53, %v1401_v45  ;;  %v1329_v34 = vmul.f32 %v1176_v17, %v3893_v19  ;;  %v1191_v14 = vadd.f32 %v3817_v5, %v3031_v46  ;;  %v4105_v19 = vld [vmem:[#allocation18_spill] sm:$0xff] }
 0x1b8   : > { %1992 = vst [vmem:[%s3171_s22 + $0x148] sm:$0xf] %v2317_v38  ;;  %1993 = vst [vmem:[%s3171_s22 + $0x14c] sm:$0x1] %v2318_v60  ;;  %v959_v7 = vadd.f32 %v3793_v30, %v3013_v42  ;;  %v1365_v57 = vadd.f32 %v1331_v6, %v1330_v1  ;;  %v967_v37 = vadd.f32 %v3822_v9, %v2908_v12  ;;  %v4106_v9 = vld [vmem:[#allocation28_spill] sm:$0xff] }
 0x1b9   : > { %v1186_v26 = vadd.f32 %v3824_v48, %v3031_v46  ;;  %v1602_v51 = vsel %vm1574_vm2, 0.0, %v1537_v52  ;;  %v1634_v55 = vsel %vm1574_vm2, %v1537_v52, 0.0  ;;  %v1472_v50 = vadd.f32 %v1440_v35, %v4105_v19 }
 0x1ba   : > { %v1364_v5 = vadd.f32 %v1329_v34, %v3885_v15  ;;  %v2323_v41 = vpack.c.bf16 %v1602_v51, %v1602_v51  ;;  %v2324_v18 = vpack.c.bf16 %v1634_v55, %v1634_v55  ;;  %v1404_v42 = vmul.f32 %v3466_v4, %v1365_v57  ;;  %v2433_v15 = vld [vmem:[%s4020_s3] ss:$0 sm:$0xff] }
 0x1bb   : > { %v1335_v30 = vmul.f32 %v1191_v14, %v965_v49  ;;  %v1536_v61 = vrot.slane %v1472_v50, 7  ;;  %v1334_v46 = vmul.f32 %v967_v37, %v4106_v9  ;;  %v1333_v48 = vmul.f32 %v1186_v26, %v959_v7 }
 0x1bc   : > { %v1403_v12 = vmul.f32 %v3466_v4, %v1364_v5  ;;  %v1269_v3 = vadd.f32 %v2432_v39, %v4107_v32  ;;  %v1231_v21 = vmul.f32 %v2433_v15, %v4108_v25  ;;  %v1232_v62 = vmul.f32 %v2433_v15, %v4109_v11  ;;  %1998 = vst [vmem:[%s3171_s22 + $0x160] sm:$0xf] %v2323_v41 }
 0x1bd   : > { %1999 = vst [vmem:[%s3171_s22 + $0x164] sm:$0x1] %v2324_v18  ;;  %v1443_v28 = vadd.f32 %v3486_v53, %v1404_v42  ;;  %v1601_v40 = vsel %vm1574_vm2, 0.0, %v1536_v61  ;;  %v1633_v27 = vsel %vm1574_vm2, %v1536_v61, 0.0  ;;  %v1367_v1 = vadd.f32 %v1335_v30, %v1334_v46 }
 0x1be   : > { %v1442_v63 = vadd.f32 %v3486_v53, %v1403_v12  ;;  %v2321_v0 = vpack.c.bf16 %v1601_v40, %v1601_v40  ;;  %v2322_v29 = vpack.c.bf16 %v1633_v27, %v1633_v27  ;;  %v1366_v23 = vadd.f32 %v1333_v48, %v1332_v10 }
 0x1bf   : > { %v1475_v22 = vadd.f32 %v1443_v28, %v1269_v3  ;;  %v1406_v56 = vmul.f32 %v3466_v4, %v1367_v1  ;;  %v1270_v16 = vadd.f32 %v2432_v39, %v1231_v21  ;;  %v1271_v54 = vadd.f32 %v2432_v39, %v1232_v62 }
 0x1c0   : > { %v1474_v20 = vadd.f32 %v1442_v63, %v4110_v33  ;;  %1996 = vst [vmem:[%s3171_s22 + $0x158] sm:$0xf] %v2321_v0  ;;  %1997 = vst [vmem:[%s3171_s22 + $0x15c] sm:$0x1] %v2322_v29  ;;  %v1405_v47 = vmul.f32 %v3466_v4, %v1366_v23 }
 0x1c1   : > { %v1539_v59 = vrot.slane %v1475_v22, 7  ;;  %v1445_v43 = vadd.f32 %v3486_v53, %v1406_v56 }
 0x1c2   : > { %v1538_v24 = vrot.slane %v1474_v20, 7  ;;  %v1444_v17 = vadd.f32 %v3486_v53, %v1405_v47 }
 0x1c3   : > { %v1604_v44 = vsel %vm1574_vm2, 0.0, %v1539_v59  ;;  %v1636_v58 = vsel %vm1574_vm2, %v1539_v59, 0.0  ;;  %v1477_v45 = vadd.f32 %v1445_v43, %v1271_v54 }
 0x1c4   : > { %v2327_v49 = vpack.c.bf16 %v1604_v44, %v1604_v44  ;;  %v2328_v8 = vpack.c.bf16 %v1636_v58, %v1636_v58  ;;  %v1603_v31 = vsel %vm1574_vm2, 0.0, %v1538_v24  ;;  %v1635_v4 = vsel %vm1574_vm2, %v1538_v24, 0.0 }
 0x1c5   : > { %v2325_v13 = vpack.c.bf16 %v1603_v31, %v1603_v31  ;;  %v2326_v36 = vpack.c.bf16 %v1635_v4, %v1635_v4  ;;  %v1476_v38 = vadd.f32 %v1444_v17, %v1270_v16  ;;  %v1541_v60 = vrot.slane %v1477_v45, 7 }
 0x1c6   : > { %2002 = vst [vmem:[%s3171_s22 + $0x170] sm:$0xf] %v2327_v49  ;;  %2003 = vst [vmem:[%s3171_s22 + $0x174] sm:$0x1] %v2328_v8 }
 0x1c7   : > { %2000 = vst [vmem:[%s3171_s22 + $0x168] sm:$0xf] %v2325_v13  ;;  %2001 = vst [vmem:[%s3171_s22 + $0x16c] sm:$0x1] %v2326_v36  ;;  %v1540_v53 = vrot.slane %v1476_v38, 7  ;;  %v1606_v6 = vsel %vm1574_vm2, 0.0, %v1541_v60 }
 0x1c8   : > { %v1638_v2 = vsel %vm1574_vm2, %v1541_v60, 0.0  ;;  %v2331_v35 = vpack.c.bf16 %v1606_v6, %v1606_v6 }
 0x1c9   : > { %v1605_v10 = vsel %vm1574_vm2, 0.0, %v1540_v53  ;;  %v1637_v52 = vsel %vm1574_vm2, %v1540_v53, 0.0  ;;  %v2332_v34 = vpack.c.bf16 %v1638_v2, %v1638_v2 }
 0x1ca   : > { %v2329_v14 = vpack.c.bf16 %v1605_v10, %v1605_v10  ;;  %v2330_v7 = vpack.c.bf16 %v1637_v52, %v1637_v52  ;;  %2006 = vst [vmem:[%s3171_s22 + $0x180] sm:$0xf] %v2331_v35 }
 0x1cb   : > { %2007 = vst [vmem:[%s3171_s22 + $0x184] sm:$0x1] %v2332_v34 }
 0x1cc   : > { %2004 = vst [vmem:[%s3171_s22 + $0x178] sm:$0xf] %v2329_v14  ;;  %2005 = vst [vmem:[%s3171_s22 + $0x17c] sm:$0x1] %v2330_v7 }
 0x1cd PF: > { %s17_s24 = sadd.s32 1, %s2440_s24  }
 0x1ce   : > { %p14_p4 = scmp.ge.s32.totalorder %s17_s24, 4  }
 0x1d0   :  { %16 = sbr.rel (!%p14_p4) target bundleno = 1 (0x1), region = 78 }

</bundles_post_ra>
